<compile_context>
chip_gen: v6e
topology: v6e:2x2x1
jax: 0.10.0
libtpu: 0.0.40
codegen_flags: <defaults>
</compile_context>

<pallas_src>
from functools import partial

import jax
import jax.numpy as jnp
from jax.experimental import pallas as pl
from jax.experimental.pallas import tpu as pltpu

LANE = 128            # every feature dim is zero-padded to one full lane width
DEFAULT_TILE = 512    # row / K tile for the streamed-adjacency (large-N) path


def _round_up(x, m):
    return (x + m - 1) // m * m


def _vmem_budget_bytes():
    """Generation-aware scoped-VMEM budget (v5e/v6e: 128 MiB, v7x: 64 MiB phys)."""
    cap = 64 * 1024 * 1024
    try:
        cap = int(getattr(pltpu.get_tpu_info(), "vmem_capacity_bytes", cap))
    except Exception:
        pass
    return int(cap * 0.80)   # leave headroom for compiler-internal scratch


# ----------------------------- Pallas kernels ------------------------------ #

def fused_gnn_kernel(a_ref, x_ref, invdeg_ref,
                     w1_ref, b1_ref, w2_ref, b2_ref,
                     w3_ref, b3_ref, w4_ref, b4_ref,
                     o_ref, cat_ref):
    """All four SAGEConv layers fused; A read once, intermediates stay in VMEM."""
    a = a_ref[...]               # (N, N)  bf16 adjacency counts (exact small ints)
    inv_deg = invdeg_ref[...]    # (N, 1)  f32 exact mean normalisation

    def sage_layer(x_in, w_ref, b_ref, relu):
        # mean aggregation: adjacency matmul on MXU, exact f32 1/deg scale on VPU
        agg = jnp.dot(a, x_in, preferred_element_type=jnp.float32) * inv_deg
        # stage [agg | x] in a persistent VMEM scratch -> one K=2*LANE MXU pass,
        # no per-layer (N, 2*LANE) concatenate temporaries
        cat_ref[:, :LANE] = agg.astype(cat_ref.dtype)
        cat_ref[:, LANE:] = x_in
        out = jnp.dot(cat_ref[...], w_ref[...], preferred_element_type=jnp.float32)
        out = out + b_ref[...]                       # f32 epilogue
        if relu:
            out = jnp.maximum(out, 0.0)
        return out.astype(x_in.dtype)                # bf16 inter-layer activation

    h  = sage_layer(x_ref[...], w1_ref, b1_ref, relu=True)    # conv1 + ReLU
    z  = sage_layer(h,          w2_ref, b2_ref, relu=False)   # conv2 (latent)
    h2 = sage_layer(z,          w3_ref, b3_ref, relu=True)    # conv3 + ReLU
    xh = sage_layer(h2,         w4_ref, b4_ref, relu=False)   # conv4 (recon)

    o_ref[...] = xh                                   # bf16, lane-dense store


def sage_layer_tiled_kernel(a_ref, hk_ref, hi_ref, invdeg_ref, w_ref, b_ref,
                            o_ref, acc_ref, *, relu):
    """One SAGEConv layer; adjacency streamed in (tm, tk) blocks, K axis last."""
    k = pl.program_id(1)

    @pl.when(k == 0)
    def _():
        acc_ref[...] = jnp.zeros_like(acc_ref)

    acc_ref[...] += jnp.dot(a_ref[...], hk_ref[...],
                            preferred_element_type=jnp.float32)

    @pl.when(k == pl.num_programs(1) - 1)
    def _():
        agg = (acc_ref[...] * invdeg_ref[...]).astype(hi_ref.dtype)
        # two K=128 dots (no lane concat temp); f32 accumulation + epilogue
        out = jnp.dot(agg, w_ref[:LANE, :], preferred_element_type=jnp.float32)
        out = out + jnp.dot(hi_ref[...], w_ref[LANE:, :],
                            preferred_element_type=jnp.float32)
        out = out + b_ref[...]
        if relu:
            out = jnp.maximum(out, 0.0)
        o_ref[...] = out.astype(o_ref.dtype)


# ----------------------------- wrapper / glue ------------------------------ #

def pack_sage_params(w_l, w_r, b, pad=LANE):
    """Stack + zero-pad one layer's params: W = [W_l ; W_r] (2*pad, pad) bf16, b (1, pad) f32."""
    f_in, f_out = w_l.shape
    w = jnp.zeros((2 * pad, pad), jnp.float32)
    w = w.at[:f_in, :f_out].set(w_l)                 # neighbour branch rows
    w = w.at[pad:pad + f_in, :f_out].set(w_r)        # self branch rows
    bb = jnp.zeros((1, pad), jnp.float32).at[0, :f_out].set(b)
    return w.astype(jnp.bfloat16), bb


def build_graph_operands(edge_index, num_nodes):
    """Adjacency counts (exact small ints) + exact f32 inverse in-degree."""
    src, dst = edge_index[0], edge_index[1]
    a = jnp.zeros((num_nodes, num_nodes), jnp.float32)
    a = a.at[dst, src].add(1.0)                       # A[i, j] = #edges j -> i
    deg = jnp.sum(a, axis=1, keepdims=True)           # in-degree per node
    inv_deg = jnp.where(deg > 0, 1.0 / jnp.maximum(deg, 1.0), 0.0)
    return a, inv_deg


def _forward_fused(flat_params, packed, x, a, inv_deg, vmem_limit):
    n, f_in = x.shape
    n_pad = _round_up(n, LANE)

    a_pad = jnp.zeros((n_pad, n_pad), jnp.float32).at[:n, :n].set(a).astype(jnp.bfloat16)
    x_pad = jnp.zeros((n_pad, LANE), jnp.float32).at[:n, :f_in].set(x).astype(jnp.bfloat16)
    d_pad = jnp.zeros((n_pad, 1), jnp.float32).at[:n, :].set(inv_deg)

    vmem = pl.BlockSpec(memory_space=pltpu.MemorySpace.VMEM)
    n_inputs = 3 + len(flat_params)

    bytes_in = (a_pad.size + x_pad.size) * 2 + d_pad.size * 4 \
        + sum(int(w.size) * 2 + int(b.size) * 4 for w, b in packed)
    cost = pl.CostEstimate(
        flops=4 * (2 * n_pad * n_pad * LANE + 2 * n_pad * (2 * LANE) * LANE),
        transcendentals=0,
        bytes_accessed=bytes_in + n_pad * LANE * 2,   # bf16 output writeback
    )

    out = pl.pallas_call(
        fused_gnn_kernel,
        out_shape=jax.ShapeDtypeStruct((n_pad, LANE), jnp.bfloat16),
        in_specs=[vmem] * n_inputs,
        out_specs=vmem,
        scratch_shapes=[pltpu.VMEM((n_pad, 2 * LANE), jnp.bfloat16)],
        compiler_params=pltpu.CompilerParams(vmem_limit_bytes=vmem_limit),
        cost_estimate=cost,
    )(a_pad, x_pad, d_pad, *flat_params)

    return out[:n, :f_in].astype(jnp.float32)


def _sage_layer_tiled(a, inv_deg, h_in, w, b, relu, *, tile, vmem_limit):
    n = a.shape[0]
    tm = tk = tile
    grid = (n // tm, n // tk)
    cost = pl.CostEstimate(
        flops=2 * n * n * LANE + 2 * n * (2 * LANE) * LANE,
        transcendentals=0,
        bytes_accessed=int(a.size) * 2 + int(h_in.size) * 2 * (1 + grid[0])
        + n * 4 + int(w.size) * 2 + int(b.size) * 4 + n * LANE * 2,
    )
    return pl.pallas_call(
        partial(sage_layer_tiled_kernel, relu=relu),
        out_shape=jax.ShapeDtypeStruct((n, LANE), jnp.bfloat16),
        grid_spec=pltpu.PrefetchScalarGridSpec(
            num_scalar_prefetch=0,
            grid=grid,
            in_specs=[
                pl.BlockSpec((tm, tk), lambda i, k: (i, k)),          # A block (streamed)
                pl.BlockSpec((tk, LANE), lambda i, k: (k, 0)),        # H, aggregation stream
                pl.BlockSpec((tm, LANE), lambda i, k: (i, 0)),        # H, self rows
                pl.BlockSpec((tm, 1), lambda i, k: (i, 0)),           # inverse in-degree
                pl.BlockSpec((2 * LANE, LANE), lambda i, k: (0, 0)),  # stacked [W_l; W_r]
                pl.BlockSpec((1, LANE), lambda i, k: (0, 0)),         # bias
            ],
            out_specs=pl.BlockSpec((tm, LANE), lambda i, k: (i, 0)),
            scratch_shapes=[pltpu.VMEM((tm, LANE), jnp.float32)],
        ),
        compiler_params=pltpu.CompilerParams(
            dimension_semantics=("parallel", "arbitrary"),
            vmem_limit_bytes=vmem_limit),
        cost_estimate=cost,
    )(a, h_in, h_in, inv_deg, w, b)


def _forward_tiled(packed, x, a, inv_deg, vmem_limit, tile=DEFAULT_TILE):
    n, f_in = x.shape
    tile = min(tile, _round_up(n, LANE))
    n_pad = _round_up(n, tile)

    a_pad = jnp.zeros((n_pad, n_pad), jnp.float32).at[:n, :n].set(a).astype(jnp.bfloat16)
    d_pad = jnp.zeros((n_pad, 1), jnp.float32).at[:n, :].set(inv_deg)
    h = jnp.zeros((n_pad, LANE), jnp.float32).at[:n, :f_in].set(x).astype(jnp.bfloat16)

    relus = (True, False, True, False)
    for (w, b), relu in zip(packed, relus):
        h = _sage_layer_tiled(a_pad, d_pad, h, w, b, relu,
                              tile=tile, vmem_limit=vmem_limit)
    return h[:n, :f_in].astype(jnp.float32)


def gnn_autoencoder_forward(params, x, a, inv_deg, *, force_path=None,
                            tile=DEFAULT_TILE):
    """encode: relu(conv1) -> conv2 ; decode: relu(conv3) -> conv4."""
    n, _ = x.shape
    packed = [pack_sage_params(*p) for p in params]
    flat_params = [t for wb in packed for t in wb]

    budget = _vmem_budget_bytes()
    n_pad = _round_up(n, LANE)
    fused_bytes = 2 * n_pad * n_pad \
        + n_pad * (2 * LANE + 2 * 2 * LANE + 2 * LANE + 4) \
        + sum(int(w.size) * 2 + int(b.size) * 4 for w, b in packed)
    if force_path is None:
        use_fused = fused_bytes <= budget
    else:
        use_fused = (force_path == "fused")

    if use_fused:
        return _forward_fused(flat_params, packed, x, a, inv_deg, budget)
    return _forward_tiled(packed, x, a, inv_deg, budget, tile)


def init_sage_params(key, f_in, f_out):
    """Deterministic glorot-uniform-ish init for one SAGEConv layer."""
    k1, k2 = jax.random.split(key)
    limit = (6.0 / (f_in + f_out)) ** 0.5
    w_l = jax.random.uniform(k1, (f_in, f_out), jnp.float32, -limit, limit)
    w_r = jax.random.uniform(k2, (f_in, f_out), jnp.float32, -limit, limit)
    b = jnp.zeros((f_out,), jnp.float32)
    return w_l, w_r, b


def reference_forward(params, x, a, inv_deg):
    """Pure-JAX reference mirroring the kernel's bf16/f32 mixed precision."""
    a16 = a.astype(jnp.bfloat16)
    h = x.astype(jnp.bfloat16)
    relus = (True, False, True, False)
    for (w_l, w_r, b), relu in zip(params, relus):
        agg = jnp.dot(a16, h, preferred_element_type=jnp.float32) * inv_deg
        out = jnp.dot(agg.astype(jnp.bfloat16), w_l.astype(jnp.bfloat16),
                      preferred_element_type=jnp.float32)
        out = out + jnp.dot(h, w_r.astype(jnp.bfloat16),
                            preferred_element_type=jnp.float32)
        out = out + b
        if relu:
            out = jnp.maximum(out, 0.0)
        h = out.astype(jnp.bfloat16)
    return h.astype(jnp.float32)


# ---------------------------------- main ----------------------------------- #

if __name__ == "__main__":
    INPUT_DIM, HIDDEN_DIM, LATENT_DIM = 8, 32, 16
    NUM_NODES = 16

    key = jax.random.PRNGKey(0)
    k_x, k_e, k1, k2, k3, k4 = jax.random.split(key, 6)

    # Node features (N, F_in)
    x = jax.random.normal(k_x, (NUM_NODES, INPUT_DIM), jnp.float32)

    # Deterministic edge_index: a ring graph plus a few random edges.
    ring_src = jnp.arange(NUM_NODES)
    ring_dst = (ring_src + 1) % NUM_NODES
    extra = jax.random.randint(k_e, (2, 16), 0, NUM_NODES)
    edge_index = jnp.concatenate(
        [jnp.stack([ring_src, ring_dst]), extra], axis=1
    ).astype(jnp.int32)                                   # (2, E)

    a, inv_deg = build_graph_operands(edge_index, NUM_NODES)

    params = (
        init_sage_params(k1, INPUT_DIM, HIDDEN_DIM),      # conv1
        init_sage_params(k2, HIDDEN_DIM, LATENT_DIM),     # conv2
        init_sage_params(k3, LATENT_DIM, HIDDEN_DIM),     # conv3
        init_sage_params(k4, HIDDEN_DIM, INPUT_DIM),      # conv4
    )

    # --- small graph: fully fused single-kernel path -------------------------
    x_hat = gnn_autoencoder_forward(params, x, a, inv_deg)
    jax.block_until_ready(x_hat)
    assert x_hat.shape == (NUM_NODES, INPUT_DIM), x_hat.shape
    assert bool(jnp.all(jnp.isfinite(x_hat)))

    ref = reference_forward(params, x, a, inv_deg)
    rel = float(jnp.max(jnp.abs(x_hat - ref)) / (jnp.max(jnp.abs(ref)) + 1e-6))
    assert rel < 5e-2, f"fused path mismatch: rel={rel}"

    # --- larger graph: exercise the streamed-adjacency tiled path ------------
    N2 = 256
    kx2, ke2 = jax.random.split(jax.random.PRNGKey(1), 2)
    x2 = jax.random.normal(kx2, (N2, INPUT_DIM), jnp.float32)
    e2 = jax.random.randint(ke2, (2, 4 * N2), 0, N2).astype(jnp.int32)
    a2, inv_deg2 = build_graph_operands(e2, N2)

    x_hat2 = gnn_autoencoder_forward(params, x2, a2, inv_deg2,
                                     force_path="tiled", tile=128)
    jax.block_until_ready(x_hat2)
    assert x_hat2.shape == (N2, INPUT_DIM), x_hat2.shape
    ref2 = reference_forward(params, x2, a2, inv_deg2)
    rel2 = float(jnp.max(jnp.abs(x_hat2 - ref2)) / (jnp.max(jnp.abs(ref2)) + 1e-6))
    assert rel2 < 5e-2, f"tiled path mismatch: rel={rel2}"

    print("KERNEL_OK")
</pallas_src>

<mosaic_0001>
module attributes {stable_mosaic.version = 11 : i64} {
  func.func @fused_gnn_kernel(%arg0: memref<128x128xbf16, #tpu.memory_space<vmem>>, %arg1: memref<128x128xbf16, #tpu.memory_space<vmem>>, %arg2: memref<128x1xf32, #tpu.memory_space<vmem>>, %arg3: memref<256x128xbf16, #tpu.memory_space<vmem>>, %arg4: memref<1x128xf32, #tpu.memory_space<vmem>>, %arg5: memref<256x128xbf16, #tpu.memory_space<vmem>>, %arg6: memref<1x128xf32, #tpu.memory_space<vmem>>, %arg7: memref<256x128xbf16, #tpu.memory_space<vmem>>, %arg8: memref<1x128xf32, #tpu.memory_space<vmem>>, %arg9: memref<256x128xbf16, #tpu.memory_space<vmem>>, %arg10: memref<1x128xf32, #tpu.memory_space<vmem>>, %arg11: memref<128x128xbf16, #tpu.memory_space<vmem>>, %arg12: memref<128x256xbf16, #tpu.memory_space<vmem>>) attributes {dimension_semantics = [], scalar_prefetch = 0 : i64, scratch_operands = 1 : i64, tpu.core_type = #tpu.core_type<tc>} {
    %c0 = arith.constant 0 : index
    %c0_0 = arith.constant 0 : index
    %0 = vector.load %arg0[%c0, %c0_0] : memref<128x128xbf16, #tpu.memory_space<vmem>>, vector<128x128xbf16>
    %c0_1 = arith.constant 0 : index
    %c0_2 = arith.constant 0 : index
    %1 = vector.load %arg2[%c0_1, %c0_2] : memref<128x1xf32, #tpu.memory_space<vmem>>, vector<128x1xf32>
    %c0_3 = arith.constant 0 : index
    %c0_4 = arith.constant 0 : index
    %2 = vector.load %arg1[%c0_3, %c0_4] : memref<128x128xbf16, #tpu.memory_space<vmem>>, vector<128x128xbf16>
    %cst = arith.constant dense<0.000000e+00> : vector<128x128xf32>
    %3 = tpu.matmul %0, %2, %cst {dimension_numbers = #tpu.dot_dimension_numbers<[1], [0], [0], [1], [0, 0, 1, 1], [], []>} : vector<128x128xbf16>, vector<128x128xbf16>, vector<128x128xf32> -> vector<128x128xf32>
    %4 = vector.broadcast %1 : vector<128x1xf32> to vector<128x128xf32>
    %5 = arith.mulf %3, %4 : vector<128x128xf32>
    %6 = arith.truncf %5 : vector<128x128xf32> to vector<128x128xbf16>
    %c0_5 = arith.constant 0 : index
    %c0_6 = arith.constant 0 : index
    %7 = vector.load %arg12[%c0_5, %c0_6] : memref<128x256xbf16, #tpu.memory_space<vmem>>, vector<128x128xbf16>
    tpu.vector_store %arg12[%c0_5, %c0_6], %6 {strides = array<i32>} : memref<128x256xbf16, #tpu.memory_space<vmem>>, vector<128x128xbf16>,
    %c0_7 = arith.constant 0 : index
    %c128 = arith.constant 128 : index
    %8 = vector.load %arg12[%c0_7, %c128] : memref<128x256xbf16, #tpu.memory_space<vmem>>, vector<128x128xbf16>
    tpu.vector_store %arg12[%c0_7, %c128], %2 {strides = array<i32>} : memref<128x256xbf16, #tpu.memory_space<vmem>>, vector<128x128xbf16>,
    %c0_8 = arith.constant 0 : index
    %c0_9 = arith.constant 0 : index
    %9 = vector.load %arg12[%c0_8, %c0_9] : memref<128x256xbf16, #tpu.memory_space<vmem>>, vector<128x256xbf16>
    %c0_10 = arith.constant 0 : index
    %c0_11 = arith.constant 0 : index
    %10 = vector.load %arg3[%c0_10, %c0_11] : memref<256x128xbf16, #tpu.memory_space<vmem>>, vector<256x128xbf16>
    %cst_12 = arith.constant dense<0.000000e+00> : vector<128x128xf32>
    %11 = tpu.matmul %9, %10, %cst_12 {dimension_numbers = #tpu.dot_dimension_numbers<[1], [0], [0], [1], [0, 0, 1, 1], [], []>} : vector<128x256xbf16>, vector<256x128xbf16>, vector<128x128xf32> -> vector<128x128xf32>
    %c0_13 = arith.constant 0 : index
    %c0_14 = arith.constant 0 : index
    %12 = vector.load %arg4[%c0_13, %c0_14] : memref<1x128xf32, #tpu.memory_space<vmem>>, vector<1x128xf32>
    %13 = vector.broadcast %12 : vector<1x128xf32> to vector<128x128xf32>
    %14 = arith.addf %11, %13 : vector<128x128xf32>
    %cst_15 = arith.constant 0.000000e+00 : f32
    %15 = vector.broadcast %cst_15 : f32 to vector<128x128xf32>
    %16 = arith.maximumf %14, %15 : vector<128x128xf32>
    %17 = arith.truncf %16 : vector<128x128xf32> to vector<128x128xbf16>
    %cst_16 = arith.constant dense<0.000000e+00> : vector<128x128xf32>
    %18 = tpu.matmul %0, %17, %cst_16 {dimension_numbers = #tpu.dot_dimension_numbers<[1], [0], [0], [1], [0, 0, 1, 1], [], []>} : vector<128x128xbf16>, vector<128x128xbf16>, vector<128x128xf32> -> vector<128x128xf32>
    %19 = vector.broadcast %1 : vector<128x1xf32> to vector<128x128xf32>
    %20 = arith.mulf %18, %19 : vector<128x128xf32>
    %21 = arith.truncf %20 : vector<128x128xf32> to vector<128x128xbf16>
    %c0_17 = arith.constant 0 : index
    %c0_18 = arith.constant 0 : index
    %22 = vector.load %arg12[%c0_17, %c0_18] : memref<128x256xbf16, #tpu.memory_space<vmem>>, vector<128x128xbf16>
    tpu.vector_store %arg12[%c0_17, %c0_18], %21 {strides = array<i32>} : memref<128x256xbf16, #tpu.memory_space<vmem>>, vector<128x128xbf16>,
    %c0_19 = arith.constant 0 : index
    %c128_20 = arith.constant 128 : index
    %23 = vector.load %arg12[%c0_19, %c128_20] : memref<128x256xbf16, #tpu.memory_space<vmem>>, vector<128x128xbf16>
    tpu.vector_store %arg12[%c0_19, %c128_20], %17 {strides = array<i32>} : memref<128x256xbf16, #tpu.memory_space<vmem>>, vector<128x128xbf16>,
    %c0_21 = arith.constant 0 : index
    %c0_22 = arith.constant 0 : index
    %24 = vector.load %arg12[%c0_21, %c0_22] : memref<128x256xbf16, #tpu.memory_space<vmem>>, vector<128x256xbf16>
    %c0_23 = arith.constant 0 : index
    %c0_24 = arith.constant 0 : index
    %25 = vector.load %arg5[%c0_23, %c0_24] : memref<256x128xbf16, #tpu.memory_space<vmem>>, vector<256x128xbf16>
    %cst_25 = arith.constant dense<0.000000e+00> : vector<128x128xf32>
    %26 = tpu.matmul %24, %25, %cst_25 {dimension_numbers = #tpu.dot_dimension_numbers<[1], [0], [0], [1], [0, 0, 1, 1], [], []>} : vector<128x256xbf16>, vector<256x128xbf16>, vector<128x128xf32> -> vector<128x128xf32>
    %c0_26 = arith.constant 0 : index
    %c0_27 = arith.constant 0 : index
    %27 = vector.load %arg6[%c0_26, %c0_27] : memref<1x128xf32, #tpu.memory_space<vmem>>, vector<1x128xf32>
    %28 = vector.broadcast %27 : vector<1x128xf32> to vector<128x128xf32>
    %29 = arith.addf %26, %28 : vector<128x128xf32>
    %30 = arith.truncf %29 : vector<128x128xf32> to vector<128x128xbf16>
    %cst_28 = arith.constant dense<0.000000e+00> : vector<128x128xf32>
    %31 = tpu.matmul %0, %30, %cst_28 {dimension_numbers = #tpu.dot_dimension_numbers<[1], [0], [0], [1], [0, 0, 1, 1], [], []>} : vector<128x128xbf16>, vector<128x128xbf16>, vector<128x128xf32> -> vector<128x128xf32>
    %32 = vector.broadcast %1 : vector<128x1xf32> to vector<128x128xf32>
    %33 = arith.mulf %31, %32 : vector<128x128xf32>
    %34 = arith.truncf %33 : vector<128x128xf32> to vector<128x128xbf16>
    %c0_29 = arith.constant 0 : index
    %c0_30 = arith.constant 0 : index
    %35 = vector.load %arg12[%c0_29, %c0_30] : memref<128x256xbf16, #tpu.memory_space<vmem>>, vector<128x128xbf16>
    tpu.vector_store %arg12[%c0_29, %c0_30], %34 {strides = array<i32>} : memref<128x256xbf16, #tpu.memory_space<vmem>>, vector<128x128xbf16>,
    %c0_31 = arith.constant 0 : index
    %c128_32 = arith.constant 128 : index
    %36 = vector.load %arg12[%c0_31, %c128_32] : memref<128x256xbf16, #tpu.memory_space<vmem>>, vector<128x128xbf16>
    tpu.vector_store %arg12[%c0_31, %c128_32], %30 {strides = array<i32>} : memref<128x256xbf16, #tpu.memory_space<vmem>>, vector<128x128xbf16>,
    %c0_33 = arith.constant 0 : index
    %c0_34 = arith.constant 0 : index
    %37 = vector.load %arg12[%c0_33, %c0_34] : memref<128x256xbf16, #tpu.memory_space<vmem>>, vector<128x256xbf16>
    %c0_35 = arith.constant 0 : index
    %c0_36 = arith.constant 0 : index
    %38 = vector.load %arg7[%c0_35, %c0_36] : memref<256x128xbf16, #tpu.memory_space<vmem>>, vector<256x128xbf16>
    %cst_37 = arith.constant dense<0.000000e+00> : vector<128x128xf32>
    %39 = tpu.matmul %37, %38, %cst_37 {dimension_numbers = #tpu.dot_dimension_numbers<[1], [0], [0], [1], [0, 0, 1, 1], [], []>} : vector<128x256xbf16>, vector<256x128xbf16>, vector<128x128xf32> -> vector<128x128xf32>
    %c0_38 = arith.constant 0 : index
    %c0_39 = arith.constant 0 : index
    %40 = vector.load %arg8[%c0_38, %c0_39] : memref<1x128xf32, #tpu.memory_space<vmem>>, vector<1x128xf32>
    %41 = vector.broadcast %40 : vector<1x128xf32> to vector<128x128xf32>
    %42 = arith.addf %39, %41 : vector<128x128xf32>
    %cst_40 = arith.constant 0.000000e+00 : f32
    %43 = vector.broadcast %cst_40 : f32 to vector<128x128xf32>
    %44 = arith.maximumf %42, %43 : vector<128x128xf32>
    %45 = arith.truncf %44 : vector<128x128xf32> to vector<128x128xbf16>
    %cst_41 = arith.constant dense<0.000000e+00> : vector<128x128xf32>
    %46 = tpu.matmul %0, %45, %cst_41 {dimension_numbers = #tpu.dot_dimension_numbers<[1], [0], [0], [1], [0, 0, 1, 1], [], []>} : vector<128x128xbf16>, vector<128x128xbf16>, vector<128x128xf32> -> vector<128x128xf32>
    %47 = vector.broadcast %1 : vector<128x1xf32> to vector<128x128xf32>
    %48 = arith.mulf %46, %47 : vector<128x128xf32>
    %49 = arith.truncf %48 : vector<128x128xf32> to vector<128x128xbf16>
    %c0_42 = arith.constant 0 : index
    %c0_43 = arith.constant 0 : index
    %50 = vector.load %arg12[%c0_42, %c0_43] : memref<128x256xbf16, #tpu.memory_space<vmem>>, vector<128x128xbf16>
    tpu.vector_store %arg12[%c0_42, %c0_43], %49 {strides = array<i32>} : memref<128x256xbf16, #tpu.memory_space<vmem>>, vector<128x128xbf16>,
    %c0_44 = arith.constant 0 : index
    %c128_45 = arith.constant 128 : index
    %51 = vector.load %arg12[%c0_44, %c128_45] : memref<128x256xbf16, #tpu.memory_space<vmem>>, vector<128x128xbf16>
    tpu.vector_store %arg12[%c0_44, %c128_45], %45 {strides = array<i32>} : memref<128x256xbf16, #tpu.memory_space<vmem>>, vector<128x128xbf16>,
    %c0_46 = arith.constant 0 : index
    %c0_47 = arith.constant 0 : index
    %52 = vector.load %arg12[%c0_46, %c0_47] : memref<128x256xbf16, #tpu.memory_space<vmem>>, vector<128x256xbf16>
    %c0_48 = arith.constant 0 : index
    %c0_49 = arith.constant 0 : index
    %53 = vector.load %arg9[%c0_48, %c0_49] : memref<256x128xbf16, #tpu.memory_space<vmem>>, vector<256x128xbf16>
    %cst_50 = arith.constant dense<0.000000e+00> : vector<128x128xf32>
    %54 = tpu.matmul %52, %53, %cst_50 {dimension_numbers = #tpu.dot_dimension_numbers<[1], [0], [0], [1], [0, 0, 1, 1], [], []>} : vector<128x256xbf16>, vector<256x128xbf16>, vector<128x128xf32> -> vector<128x128xf32>
    %c0_51 = arith.constant 0 : index
    %c0_52 = arith.constant 0 : index
    %55 = vector.load %arg10[%c0_51, %c0_52] : memref<1x128xf32, #tpu.memory_space<vmem>>, vector<1x128xf32>
    %56 = vector.broadcast %55 : vector<1x128xf32> to vector<128x128xf32>
    %57 = arith.addf %54, %56 : vector<128x128xf32>
    %58 = arith.truncf %57 : vector<128x128xf32> to vector<128x128xbf16>
    %c0_53 = arith.constant 0 : index
    %c0_54 = arith.constant 0 : index
    %59 = vector.load %arg11[%c0_53, %c0_54] : memref<128x128xbf16, #tpu.memory_space<vmem>>, vector<128x128xbf16>
    tpu.vector_store %arg11[%c0_53, %c0_54], %58 {strides = array<i32>} : memref<128x128xbf16, #tpu.memory_space<vmem>>, vector<128x128xbf16>,
    return
  }
}

</mosaic_0001>

<bundles_post_ra>
// kernel: tpu_custom_call.1
= control target key start
LH: loop header
LB: loop body
LE: loop exit
PB: predicated region body
PF: predicated region fallthrough
CT: control target
= control target key end

     0   :  { %16 = vsyncpa [#allocation4], 0  ;;  %s4546_s0 = inlined_call_operand.hbm [shape: bf16[128,128], index: 0, kind: input, shape index: {}]   ;;  %s4547_s1 = inlined_call_operand.hbm [shape: bf16[128,128], index: 1, kind: input, shape index: {}]   ;;  %s4548_s2 = inlined_call_operand.vmem [shape: f32[128,1], index: 2, kind: input, shape index: {}]   ;;  %s4549_s3 = inlined_call_operand.vmem [shape: bf16[256,128], index: 3, kind: input, shape index: {}]   ;;  %s4550_s4 = inlined_call_operand.vmem [shape: f32[1,128], index: 4, kind: input, shape index: {}]   ;;  %s4551_s5 = inlined_call_operand.hbm [shape: bf16[256,128], index: 5, kind: input, shape index: {}]   ;;  %s4552_s6 = inlined_call_operand.vmem [shape: f32[1,128], index: 6, kind: input, shape index: {}]   ;;  %s4553_s7 = inlined_call_operand.hbm [shape: bf16[256,128], index: 7, kind: input, shape index: {}]   ;;  %s4554_s8 = inlined_call_operand.vmem [shape: f32[1,128], index: 8, kind: input, shape index: {}]   ;;  %s4555_s9 = inlined_call_operand.hbm [shape: bf16[256,128], index: 9, kind: input, shape index: {}]   ;;  %s4556_s10 = inlined_call_operand.vmem [shape: f32[1,128], index: 10, kind: input, shape index: {}]   ;;  %s4557_s11 = inlined_call_operand.hbm [shape: bf16[128,128], index: 11, kind: output, shape index: {}]  }
   0x1   :  { %17 = vsyncpa [#allocation7], 0 }
   0x2   :  { %18 = vsyncpa [#allocation10], 0 }
   0x3   :  { %19 = vsyncpa [#allocation5], 0  ;;  %s4025_s17 = smov [#allocation6]   ;;  %s4026_s19 = smov [#allocation9]  }
   0x4   :  { %s37_s18 = sshll.u32 %s4025_s17, 4  ;;  %s69_s20 = sshll.u32 %s4026_s19, 4  ;;  %s38_s18 = int_to_ptr.vmem [resolvable:$true] %s37_s18  ;;  %s70_s20 = int_to_ptr.vmem [resolvable:$true] %s69_s20 }
   0x5   :  { %s3905_s21 = scalar_lea.vmem %s38_s18, 1024  ;;  %p3910_p1 = scmp.lt.s32.totalorder %s38_s18, %s38_s18 }
   0x6   :  { %p3906_p0 = scmp.ne.s32.totalorder %s38_s18, %s3905_s21  ;;  %p3911_p2 = scmp.lt.s32.totalorder %s3905_s21, %s3905_s21 }
   0x8   :  { %p3912_p3 = por %p3911_p2, %p3910_p1 }
   0xa   :  { %p3913_p4 = pnand %p3912_p3, %p3906_p0 }
   0xc   :  { %3916 = shalt.err (!%p3913_p4)
}
   0xd   :  { %s4027_s22 = smov 64   ;;  %s4028_s23 = smov 4  }
   0xe   :  { %43 = dma.hbm_to_vmem [thread:$0]  %s4547_s1, 1024, %s38_s18, [#allocation7], %s4027_s22, %s4027_s22, %s4028_s23  }
   0xf   :  { %s3925_s26 = scalar_lea.vmem %s70_s20, 2048  ;;  %p3930_p6 = scmp.lt.s32.totalorder %s70_s20, %s70_s20 }
  0x10   :  { %p3926_p5 = scmp.ne.s32.totalorder %s70_s20, %s3925_s26  ;;  %p3931_p7 = scmp.lt.s32.totalorder %s3925_s26, %s3925_s26 }
  0x12   :  { %p3932_p8 = por %p3931_p7, %p3930_p6 }
  0x14   :  { %p3933_p9 = pnand %p3932_p8, %p3926_p5 }
  0x16   :  { %3936 = shalt.err (!%p3933_p9)
}
  0x17   :  { %75 = dma.hbm_to_vmem [thread:$0]  %s4553_s7, 2048, %s70_s20, [#allocation10], %s4027_s22, %s4027_s22, %s4028_s23  }
  0x18   :  { %s4029_s29 = smov [#allocation3]   ;;  %s4030_s12 = smov [#allocation8]  }
  0x19   :  { %s25_s30 = sshll.u32 %s4029_s29, 4  ;;  %s55_s13 = sshll.u32 %s4030_s12, 4  ;;  %s26_s30 = int_to_ptr.vmem [resolvable:$true] %s25_s30  ;;  %s56_s13 = int_to_ptr.vmem [resolvable:$true] %s55_s13 }
  0x1a   :  { %s3945_s1 = scalar_lea.vmem %s26_s30, 1024  ;;  %p3950_p11 = scmp.lt.s32.totalorder %s26_s30, %s26_s30 }
  0x1b   :  { %p3946_p10 = scmp.ne.s32.totalorder %s26_s30, %s3945_s1  ;;  %p3951_p12 = scmp.lt.s32.totalorder %s3945_s1, %s3945_s1 }
  0x1d   :  { %p3952_p13 = por %p3951_p12, %p3950_p11 }
  0x1f   :  { %p3953_p0 = pnand %p3952_p13, %p3946_p10 }
  0x21   :  { %3956 = shalt.err (!%p3953_p0)
}
  0x22   :  { %31 = dma.hbm_to_vmem [thread:$0]  %s4546_s0, 1024, %s26_s30, [#allocation4], %s4027_s22, %s4027_s22, %s4028_s23  }
  0x23   :  { %s3965_s7 = scalar_lea.vmem %s56_s13, 2048  ;;  %p3970_p2 = scmp.lt.s32.totalorder %s56_s13, %s56_s13 }
  0x24   :  { %p3966_p1 = scmp.ne.s32.totalorder %s56_s13, %s3965_s7  ;;  %p3971_p3 = scmp.lt.s32.totalorder %s3965_s7, %s3965_s7 }
  0x26   :  { %p3972_p4 = por %p3971_p3, %p3970_p2 }
  0x28   :  { %p3973_p5 = pnand %p3972_p4, %p3966_p1 }
  0x2a   :  { %3976 = shalt.err (!%p3973_p5)
}
  0x2b   :  { %61 = dma.hbm_to_vmem [thread:$0]  %s4551_s5, 2048, %s56_s13, [#allocation7], %s4027_s22, %s4027_s22, %s4028_s23  }
  0x2c   :  { %s4031_s18 = smov [#allocation11]  }
  0x2d   :  { %s83_s19 = sshll.u32 %s4031_s18, 4  ;;  %s84_s19 = int_to_ptr.vmem [resolvable:$true] %s83_s19 }
  0x2e   :  { %s3985_s20 = scalar_lea.vmem %s84_s19, 2048  ;;  %p3990_p7 = scmp.lt.s32.totalorder %s84_s19, %s84_s19 }
  0x2f   :  { %p3986_p6 = scmp.ne.s32.totalorder %s84_s19, %s3985_s20  ;;  %p3991_p8 = scmp.lt.s32.totalorder %s3985_s20, %s3985_s20 }
  0x31   :  { %p3992_p9 = por %p3991_p8, %p3990_p7 }
  0x33   :  { %p3993_p10 = pnand %p3992_p9, %p3986_p6 }
  0x35   :  { %3996 = shalt.err (!%p3993_p10)
}
  0x36   :  { %89 = dma.hbm_to_vmem [thread:$0]  %s4555_s9, 2048, %s84_s19, [#allocation10], %s4027_s22, %s4027_s22, %s4028_s23  }
  0x37   :  { %4017 = dma.done.wait [#allocation4], 1024  }
  0x38   :  { %4018 = vsyncadd [#allocation4], 4294966272 }
  0x39   :  { %4019 = dma.done.wait [#allocation7], 3072  }
  0x3a   :  { %4020 = vsyncadd [#allocation7], 4294964224 }
  0x3b   :  { %4021 = dma.done.wait [#allocation10], 4096  }
  0x3c   :  { %4022 = vsyncadd [#allocation10], 4294963200  ;;  %v4032_v0 = vmov 0   ;;  %v154_v1 = vld [vmem:[#allocation6 + $0x38] sm:$0xf]  ;;  %v4124_v20 = vld [vmem:[#allocation3] sm:$0xff]  }
  0x3d   :  { %3711 = vset.pattern.permute.xlu0 %v4032_v0  ;;  %3712 = vset.pattern.permute.xlu1 %v4032_v0  ;;  %v155_v2 = vld [vmem:[#allocation6 + $0x3c] sm:$0xf]  ;;  %v152_v3 = vld [vmem:[#allocation6 + $0x30] sm:$0xf]  ;;  %539 = vst [vmem:[#allocation2 + $0x74] sm:$0xf] %v154_v1 }
  0x3e   :  { %v2818_v4 = vcombine.low %v154_v1, %v155_v2  ;;  %540 = vst [vmem:[#allocation2 + $0x7c] sm:$0xf] %v155_v2  ;;  %v153_v5 = vld [vmem:[#allocation6 + $0x34] sm:$0xf]  ;;  %537 = vst [vmem:[#allocation2 + $0x64] sm:$0xf] %v152_v3  ;;  %3590 = vmatprep.mubr.bf16.mxu1 %v4124_v20  ;;  %3622 = vmatprep.mubr.bf16.mxu0 %v4124_v20 }
  0x3f   :  { %v150_v6 = vld [vmem:[#allocation6 + $0x28] sm:$0xf]  ;;  %v151_v7 = vld [vmem:[#allocation6 + $0x2c] sm:$0xf]  ;;  %v2817_v8 = vcombine.low %v152_v3, %v153_v5  ;;  %538 = vst [vmem:[#allocation2 + $0x6c] sm:$0xf] %v153_v5 }
  0x40   :  { %535 = vst [vmem:[#allocation2 + $0x54] sm:$0xf] %v150_v6  ;;  %536 = vst [vmem:[#allocation2 + $0x5c] sm:$0xf] %v151_v7  ;;  %v148_v9 = vld [vmem:[#allocation6 + $0x20] sm:$0xf]  ;;  %3574 = vmatprep.subr.bf16.mxu1 %v2818_v4  ;;  %v2816_v18 = vcombine.low %v150_v6, %v151_v7 }
  0x41   :  { %v149_v10 = vld [vmem:[#allocation6 + $0x24] sm:$0xf]  ;;  %v146_v11 = vld [vmem:[#allocation6 + $0x18] sm:$0xf]  ;;  %533 = vst [vmem:[#allocation2 + $0x44] sm:$0xf] %v148_v9  ;;  %3575 = vmatpush3.bf16.msra.mxu1 %v2818_v4 }
  0x42   :  { %534 = vst [vmem:[#allocation2 + $0x4c] sm:$0xf] %v149_v10  ;;  %v147_v12 = vld [vmem:[#allocation6 + $0x1c] sm:$0xf]  ;;  %531 = vst [vmem:[#allocation2 + $0x34] sm:$0xf] %v146_v11  ;;  %3576 = vmatprep.subr.bf16.mxu1 %v2817_v8  ;;  %v2815_v21 = vcombine.low %v148_v9, %v149_v10 }
  0x43   :  { %v144_v13 = vld [vmem:[#allocation6 + $0x10] sm:$0xf]  ;;  %v145_v14 = vld [vmem:[#allocation6 + $0x14] sm:$0xf]  ;;  %532 = vst [vmem:[#allocation2 + $0x3c] sm:$0xf] %v147_v12  ;;  %v2814_v22 = vcombine.low %v146_v11, %v147_v12 }
  0x44   :  { %529 = vst [vmem:[#allocation2 + $0x24] sm:$0xf] %v144_v13  ;;  %530 = vst [vmem:[#allocation2 + $0x2c] sm:$0xf] %v145_v14  ;;  %v142_v15 = vld [vmem:[#allocation6 + $0x8] sm:$0xf]  ;;  %v2813_v27 = vcombine.low %v144_v13, %v145_v14 }
  0x45   :  { %v143_v16 = vld [vmem:[#allocation6 + $0xc] sm:$0xf]  ;;  %v140_v17 = vld [vmem:[#allocation6] sm:$0xf]  ;;  %527 = vst [vmem:[#allocation2 + $0x14] sm:$0xf] %v142_v15  ;;  %3577 = vmatpush3.bf16.msra.mxu1 %v2817_v8 }
  0x46   :  { %528 = vst [vmem:[#allocation2 + $0x1c] sm:$0xf] %v143_v16  ;;  %v141_v19 = vld [vmem:[#allocation6 + $0x4] sm:$0xf]  ;;  %525 = vst [vmem:[#allocation2 + $0x4] sm:$0xf] %v140_v17  ;;  %3578 = vmatprep.subr.bf16.mxu1 %v2816_v18  ;;  %v2812_v30 = vcombine.low %v142_v15, %v143_v16 }
  0x47   :  { %526 = vst [vmem:[#allocation2 + $0xc] sm:$0xf] %v141_v19  ;;  %v124_v23 = vld [vmem:[%s4548_s2] sm:$0xff]  ;;  %v126_v24 = vld [vmem:[%s4548_s2 + $0x10] sm:$0xff]  ;;  %v125_v25 = vld [vmem:[%s4548_s2 + $0x8] sm:$0xff]  ;;  %v2811_v33 = vcombine.low %v140_v17, %v141_v19 }
  0x48   :  { %351 = vperm.xlu0 %3711, %v124_v23   ;;  %361 = vperm.xlu1 %3712, %v126_v24   ;;  %v127_v26 = vld [vmem:[%s4548_s2 + $0x18] sm:$0xff]  ;;  %v128_v28 = vld [vmem:[%s4548_s2 + $0x20] sm:$0xff]  ;;  %v129_v29 = vld [vmem:[%s4548_s2 + $0x28] sm:$0xff] }
  0x49   :  { %3579 = vmatpush3.bf16.msra.mxu1 %v2816_v18  ;;  %v130_v31 = vld [vmem:[%s4548_s2 + $0x30] sm:$0xff]  ;;  %v131_v32 = vld [vmem:[%s4548_s2 + $0x38] sm:$0xff]  ;;  %v132_v34 = vld [vmem:[%s4548_s2 + $0x40] sm:$0xff] }
  0x4a   :  { %3580 = vmatprep.subr.bf16.mxu1 %v2815_v21  ;;  %v133_v35 = vld [vmem:[%s4548_s2 + $0x48] sm:$0xff]  ;;  %v134_v37 = vld [vmem:[%s4548_s2 + $0x50] sm:$0xff]  ;;  %v3729_v38 = vld [vmem:[%s4549_s3 + $0x78] sm:$0xff]  }
  0x4b   :  { %v4158_v36 = vld [vmem:[#allocation3 + $0x8] sm:$0xff]   ;;  %v4166_v39 = vld [vmem:[#allocation3 + $0x10] sm:$0xff]   ;;  %v135_v40 = vld [vmem:[%s4548_s2 + $0x58] sm:$0xff] }
  0x4c   :  { %356 = vperm.xlu0 %3711, %v125_v25   ;;  %366 = vperm.xlu1 %3712, %v127_v26   ;;  %v3730_v41 = vld [vmem:[%s4549_s3 + $0x38] sm:$0xff]   ;;  %v136_v42 = vld [vmem:[%s4548_s2 + $0x60] sm:$0xff]  ;;  %v3731_v43 = vld [vmem:[%s4549_s3 + $0x70] sm:$0xff]  }
  0x4d   :  { %3581 = vmatpush3.bf16.msra.mxu1 %v2815_v21  ;;  %v137_v44 = vld [vmem:[%s4548_s2 + $0x68] sm:$0xff]  ;;  %v3732_v45 = vld [vmem:[%s4549_s3 + $0x30] sm:$0xff]   ;;  %v4191_v47 = vld [vmem:[#allocation3 + $0x18] sm:$0xff]  }
  0x4e   :  { %3582 = vmatprep.subr.bf16.mxu1 %v2814_v22  ;;  %v3733_v46 = vld [vmem:[%s4549_s3 + $0x68] sm:$0xff]   ;;  %v138_v48 = vld [vmem:[%s4548_s2 + $0x70] sm:$0xff]  ;;  %v4196_v49 = vld [vmem:[#allocation3 + $0x20] sm:$0xff]  }
  0x4f   :  { %v139_v50 = vld [vmem:[%s4548_s2 + $0x78] sm:$0xff]  ;;  %v3734_v51 = vld [vmem:[%s4549_s3 + $0x28] sm:$0xff]   ;;  %v4208_v53 = vld [vmem:[#allocation3 + $0x30] sm:$0xff]  }
  0x50   :  { %371 = vperm.xlu0 %3711, %v128_v28   ;;  %376 = vperm.xlu1 %3712, %v129_v29   ;;  %v4206_v52 = vld [vmem:[#allocation3 + $0x28] sm:$0xff]   ;;  %v4212_v54 = vld [vmem:[#allocation3 + $0x38] sm:$0xff]   ;;  %v3735_v55 = vld [vmem:[%s4549_s3 + $0x60] sm:$0xff]  }
  0x51   :  { %3583 = vmatpush3.bf16.msra.mxu1 %v2814_v22  ;;  %v3736_v56 = vld [vmem:[%s4549_s3 + $0x20] sm:$0xff]   ;;  %v3737_v57 = vld [vmem:[%s4549_s3 + $0x58] sm:$0xff]   ;;  %v3739_v59 = vld [vmem:[%s4549_s3 + $0x50] sm:$0xff]  }
  0x52   :  { %3584 = vmatprep.subr.bf16.mxu1 %v2813_v27  ;;  %v3738_v58 = vld [vmem:[%s4549_s3 + $0x18] sm:$0xff]   ;;  %v3740_v60 = vld [vmem:[%s4549_s3 + $0x10] sm:$0xff]   ;;  %v3741_v61 = vld [vmem:[%s4549_s3 + $0x48] sm:$0xff]  }
  0x53   :  { %v3742_v62 = vld [vmem:[%s4549_s3 + $0x8] sm:$0xff]   ;;  %v3743_v63 = vld [vmem:[%s4549_s3 + $0x40] sm:$0xff]  }
  0x54   :  { %381 = vperm.xlu0 %3711, %v130_v31   ;;  %386 = vperm.xlu1 %3712, %v131_v32   ;;  %v3744_v0 = vld [vmem:[%s4549_s3] sm:$0xff]  }
  0x55   :  { %3585 = vmatpush3.bf16.msra.mxu1 %v2813_v27 }
  0x56   :  { %3586 = vmatprep.subr.bf16.mxu1 %v2812_v30 }
  0x58   :  { %391 = vperm.xlu0 %3711, %v132_v34   ;;  %396 = vperm.xlu1 %3712, %v133_v35  }
  0x59   :  { %3587 = vmatpush3.bf16.msra.mxu1 %v2812_v30 }
  0x5a   :  { %3588 = vmatprep.subr.bf16.mxu1 %v2811_v33 }
  0x5c   :  { %401 = vperm.xlu0 %3711, %v134_v37   ;;  %406 = vperm.xlu1 %3712, %v135_v40  }
  0x5d   :  { %3589 = vmatpush3.bf16.msra.mxu1 %v2811_v33 }
  0x5e   :  { %3270 = vmatprep.subr.bf16.mxu1 %v3729_v38 }
  0x60   :  { %3591 = vmatmul.mubr.bf16.vlgmr.msra.gmra.mxu1 %v4158_v36  ;;  %411 = vperm.xlu0 %3711, %v136_v42  }
  0x61   :  { %3594 = vmatprep.mubr.bf16.mxu1 %v4166_v39  ;;  %3271 = vmatpush3.bf16.msra.mxu1 %v3730_v41 }
  0x62   :  { %3272 = vmatprep.subr.bf16.mxu1 %v3731_v43  ;;  %416 = vperm.xlu1 %3712, %v137_v44   ;;  %v3745_v44 = vld [vmem:[#allocation2 + $0x4] ss:$8 sps:$4 sm:$0xff]  }
  0x64   :  { %421 = vperm.xlu0 %3711, %v138_v48  }
  0x65   :  { %3273 = vmatpush3.bf16.msra.mxu1 %v3732_v45 }
  0x66   :  { %3274 = vmatprep.subr.bf16.mxu1 %v3733_v46  ;;  %426 = vperm.xlu1 %3712, %v139_v50  }
  0x68   :  { %3595 = vmatmul.mubr.bf16.gmra.mxu1 %v4191_v47 }
  0x69   :  { %3598 = vmatprep.mubr.bf16.mxu1 %v4196_v49  ;;  %3275 = vmatpush3.bf16.msra.mxu1 %v3734_v51  ;;  %v3748_v51 = vld [vmem:[#allocation2 + $0x14] ss:$8 sps:$4 sm:$0xff]  }
  0x6a   :  { %3276 = vmatprep.subr.bf16.mxu1 %v3735_v55 }
  0x6d   :  { %3277 = vmatpush3.bf16.msra.mxu1 %v3736_v56 }
  0x6e   :  { %3278 = vmatprep.subr.bf16.mxu1 %v3737_v57 }
  0x70   :  { %3599 = vmatmul.mubr.bf16.gmra.mxu1 %v4206_v52 }
  0x71   :  { %3602 = vmatprep.mubr.bf16.mxu1 %v4208_v53  ;;  %3279 = vmatpush3.bf16.msra.mxu1 %v3738_v58 }
  0x72   :  { %3280 = vmatprep.subr.bf16.mxu1 %v3739_v59 }
  0x75   :  { %3281 = vmatpush3.bf16.msra.mxu1 %v3740_v60 }
  0x76   :  { %3282 = vmatprep.subr.bf16.mxu1 %v3741_v61 }
  0x78   :  { %3603 = vmatmul.mubr.bf16.gmra.mxu1 %v4212_v54 }
  0x79   :  { %3283 = vmatpush3.bf16.msra.mxu1 %v3742_v62  ;;  %804 = vmatprep.mubr.bf16.mxu1 %v3745_v44 }
  0x7a   :  { %3284 = vmatprep.subr.bf16.mxu1 %v3743_v63 }
  0x7d   :  { %3285 = vmatpush3.bf16.msra.mxu1 %v3744_v0 }
  0xc3   :  { %v4245_v1 = vpop.permute.xlu0 %351  ;;  %v4247_v2 = vpop.permute.xlu1 %361 }
  0xc7   :  { %v4249_v3 = vpop.permute.xlu0 %356  ;;  %v4251_v4 = vpop.permute.xlu1 %366 }
  0xcb   :  { %v4253_v5 = vpop.permute.xlu0 %371  ;;  %v4255_v6 = vpop.permute.xlu1 %376 }
  0xcf   :  { %v4257_v7 = vpop.permute.xlu0 %381  ;;  %v4261_v13 = vpop.permute.xlu1 %386 }
  0xd3   :  { %v4264_v17 = vpop.permute.xlu0 %391  ;;  %v4268_v25 = vpop.permute.xlu1 %396 }
  0xd7   :  { %v4271_v29 = vpop.permute.xlu0 %401  ;;  %v4275_v37 = vpop.permute.xlu1 %406 }
  0xdb   :  { %v4278_v42 = vpop.permute.xlu0 %411 }
  0xdd   :  { %v4282_v57 = vpop.permute.xlu1 %416 }
  0xdf   :  { %v4285_v61 = vpop.permute.xlu0 %421 }
 0x120   :  { %v3592_v8 = vpop.f32.mrf.mxu1 }
 0x121   :  { %v431_v9 = vmul.f32 %v3592_v8, %v4247_v2 }
 0x122   :  { %v286_v10 = vpop.f32.mrf.mxu1 }
 0x123   :  { %v3081_v11 = vpack.c.bf16 %v431_v9, %v431_v9  ;;  %v429_v12 = vmul.f32 %v4245_v1, %v286_v10 }
 0x124   :  { %v3593_v14 = vpop.f32.mrf.mxu1 }
 0x125   :  { %511 = vst [vmem:[#allocation2 + $0x10] sm:$0xf] %v3081_v11  ;;  %v3079_v15 = vpack.c.bf16 %v429_v12, %v429_v12  ;;  %v432_v16 = vmul.f32 %v3593_v14, %v4251_v4  ;;  %v4289_v12 = vpop.permute.xlu1 %426 }
 0x126   :  { %v289_v18 = vpop.f32.mrf.mxu1 }
 0x127   :  { %509 = vst [vmem:[#allocation2] sm:$0xf] %v3079_v15  ;;  %v3082_v19 = vpack.c.bf16 %v432_v16, %v432_v16  ;;  %v430_v21 = vmul.f32 %v4249_v3, %v289_v18  ;;  %v3751_v15 = vld [vmem:[#allocation2 + $0x24] ss:$8 sps:$4 sm:$0xff]  }
 0x128   :  { %v3596_v22 = vpop.f32.mrf.mxu1 }
 0x129   :  { %512 = vst [vmem:[#allocation2 + $0x18] sm:$0xf] %v3082_v19  ;;  %v3080_v23 = vpack.c.bf16 %v430_v21, %v430_v21  ;;  %v435_v24 = vmul.f32 %v3596_v22, %v4257_v7 }
 0x12a   :  { %v302_v26 = vpop.f32.mrf.mxu1 }
 0x12b   :  { %510 = vst [vmem:[#allocation2 + $0x8] sm:$0xf] %v3080_v23  ;;  %v3085_v27 = vpack.c.bf16 %v435_v24, %v435_v24  ;;  %v433_v28 = vmul.f32 %v4253_v5, %v302_v26  ;;  %v3754_v26 = vld [vmem:[#allocation2 + $0x34] ss:$8 sps:$4 sm:$0xff]  }
 0x12c   :  { %v3597_v30 = vpop.f32.mrf.mxu1 }
 0x12d   :  { %515 = vst [vmem:[#allocation2 + $0x30] sm:$0xf] %v3085_v27  ;;  %v3083_v31 = vpack.c.bf16 %v433_v28, %v433_v28  ;;  %v436_v32 = vmul.f32 %v3597_v30, %v4261_v13  ;;  %v3757_v28 = vld [vmem:[#allocation2 + $0x44] ss:$8 sps:$4 sm:$0xff]  }
 0x12e   :  { %v305_v33 = vpop.f32.mrf.mxu1 }
 0x12f   :  { %513 = vst [vmem:[#allocation2 + $0x20] sm:$0xf] %v3083_v31  ;;  %v3086_v34 = vpack.c.bf16 %v436_v32, %v436_v32  ;;  %v434_v35 = vmul.f32 %v4255_v6, %v305_v33  ;;  %v3760_v31 = vld [vmem:[#allocation2 + $0x54] ss:$8 sps:$4 sm:$0xff]   ;;  %v3763_v33 = vld [vmem:[#allocation2 + $0x64] ss:$8 sps:$4 sm:$0xff]  }
 0x130   :  { %v3600_v38 = vpop.f32.mrf.mxu1  ;;  %v3750_v11 = vld [vmem:[#allocation2 + $0x10] ss:$8 sps:$4 sm:$0xff]  }
 0x131   :  { %516 = vst [vmem:[#allocation2 + $0x38] sm:$0xf] %v3086_v34  ;;  %v3084_v40 = vpack.c.bf16 %v434_v35, %v434_v35  ;;  %v439_v41 = vmul.f32 %v3600_v38, %v4271_v29  ;;  %v3766_v35 = vld [vmem:[#allocation2 + $0x74] ss:$8 sps:$4 sm:$0xff]  }
 0x132   :  { %v318_v43 = vpop.f32.mrf.mxu1  ;;  %v3747_v45 = vld [vmem:[#allocation2] ss:$8 sps:$4 sm:$0xff]  }
 0x133   :  { %514 = vst [vmem:[#allocation2 + $0x28] sm:$0xf] %v3084_v40  ;;  %v3089_v46 = vpack.c.bf16 %v439_v41, %v439_v41  ;;  %v437_v48 = vmul.f32 %v4264_v17, %v318_v43  ;;  %805 = vmatmul.mubr.bf16.vlgmr.msra.gmra.mxu1 %v3747_v45  ;;  %v4297_v41 = vld [vmem:[%s4550_s4] ss:$0 sm:$0xff] }
 0x134   :  { %v3601_v50 = vpop.f32.mrf.mxu1  ;;  %812 = vmatprep.mubr.bf16.mxu1 %v3748_v51 }
 0x135   :  { %519 = vst [vmem:[#allocation2 + $0x50] sm:$0xf] %v3089_v46  ;;  %v3087_v55 = vpack.c.bf16 %v437_v48, %v437_v48  ;;  %v440_v56 = vmul.f32 %v3601_v50, %v4275_v37 }
 0x136   :  { %v321_v58 = vpop.f32.mrf.mxu1 }
 0x137   :  { %517 = vst [vmem:[#allocation2 + $0x40] sm:$0xf] %v3087_v55  ;;  %v3090_v59 = vpack.c.bf16 %v440_v56, %v440_v56  ;;  %v438_v60 = vmul.f32 %v4268_v25, %v321_v58 }
 0x138   :  { %v3604_v62 = vpop.f32.mrf.mxu1  ;;  %v3756_v27 = vld [vmem:[#allocation2 + $0x30] ss:$8 sps:$4 sm:$0xff]  }
 0x139   :  { %520 = vst [vmem:[#allocation2 + $0x58] sm:$0xf] %v3090_v59  ;;  %v3088_v63 = vpack.c.bf16 %v438_v60, %v438_v60  ;;  %v443_v0 = vmul.f32 %v3604_v62, %v4285_v61 }
 0x13a   :  { %v334_v8 = vpop.f32.mrf.mxu1  ;;  %v3753_v24 = vld [vmem:[#allocation2 + $0x20] ss:$8 sps:$4 sm:$0xff]  }
 0x13b   :  { %518 = vst [vmem:[#allocation2 + $0x48] sm:$0xf] %v3088_v63  ;;  %v3093_v9 = vpack.c.bf16 %v443_v0, %v443_v0  ;;  %v441_v10 = vmul.f32 %v4278_v42, %v334_v8  ;;  %813 = vmatmul.mubr.bf16.gmra.mxu1 %v3750_v11 }
 0x13c   :  { %v3605_v14 = vpop.f32.mrf.mxu1  ;;  %820 = vmatprep.mubr.bf16.mxu1 %v3751_v15 }
 0x13d   :  { %523 = vst [vmem:[#allocation2 + $0x70] sm:$0xf] %v3093_v9  ;;  %v3091_v16 = vpack.c.bf16 %v441_v10, %v441_v10  ;;  %v444_v18 = vmul.f32 %v3605_v14, %v4289_v12 }
 0x13e   :  { %v337_v19 = vpop.f32.mrf.mxu1 }
 0x13f   :  { %521 = vst [vmem:[#allocation2 + $0x60] sm:$0xf] %v3091_v16  ;;  %v3094_v21 = vpack.c.bf16 %v444_v18, %v444_v18  ;;  %v442_v22 = vmul.f32 %v4282_v57, %v337_v19 }
 0x140   :  { %v3762_v32 = vld [vmem:[#allocation2 + $0x50] ss:$8 sps:$4 sm:$0xff]  }
 0x141   :  { %524 = vst [vmem:[#allocation2 + $0x78] sm:$0xf] %v3094_v21  ;;  %v3092_v23 = vpack.c.bf16 %v442_v22, %v442_v22 }
 0x142   :  { %v3759_v30 = vld [vmem:[#allocation2 + $0x40] ss:$8 sps:$4 sm:$0xff]  }
 0x143   :  { %522 = vst [vmem:[#allocation2 + $0x68] sm:$0xf] %v3092_v23  ;;  %821 = vmatmul.mubr.bf16.gmra.mxu1 %v3753_v24 }
 0x144   :  { %828 = vmatprep.mubr.bf16.mxu1 %v3754_v26 }
 0x148   :  { %v3768_v38 = vld [vmem:[#allocation2 + $0x70] ss:$8 sps:$4 sm:$0xff]  }
 0x14a   :  { %v3765_v34 = vld [vmem:[#allocation2 + $0x60] ss:$8 sps:$4 sm:$0xff]  }
 0x14b   :  { %829 = vmatmul.mubr.bf16.gmra.mxu1 %v3756_v27 }
 0x14c   :  { %836 = vmatprep.mubr.bf16.mxu1 %v3757_v28 }
 0x153   :  { %837 = vmatmul.mubr.bf16.gmra.mxu1 %v3759_v30 }
 0x154   :  { %844 = vmatprep.mubr.bf16.mxu1 %v3760_v31 }
 0x15b   :  { %845 = vmatmul.mubr.bf16.gmra.mxu1 %v3762_v32 }
 0x15c   :  { %852 = vmatprep.mubr.bf16.mxu1 %v3763_v33 }
 0x163   :  { %853 = vmatmul.mubr.bf16.gmra.mxu1 %v3765_v34 }
 0x164   :  { %860 = vmatprep.mubr.bf16.mxu1 %v3766_v35 }
 0x16b   :  { %861 = vmatmul.mubr.bf16.gmra.mxu1 %v3768_v38 }
 0x16c   :  { %3654 = vmatprep.mubr.bf16.mxu1 %v4124_v20 }
 0x1f3   :  { %v3286_v40 = vpop.f32.mrf.mxu1 }
 0x1f5   :  { %v3287_v43 = vpop.f32.mrf.mxu1 }
 0x1f6   :  { %v3288_v44 = vadd.f32 %v3287_v43, %v3286_v40 }
 0x1f7   :  { %v3289_v45 = vpop.f32.mrf.mxu1 }
 0x1f8   :  { %v807_v46 = vadd.f32 %v3288_v44, %v4297_v41 }
 0x1f9   :  { %v3290_v48 = vpop.f32.mrf.mxu1 }
 0x1fa   :  { %v869_v50 = vmax.f32 %v807_v46, 0.0  ;;  %v3291_v51 = vadd.f32 %v3290_v48, %v3289_v45 }
 0x1fb   :  { %v3292_v55 = vpop.f32.mrf.mxu1 }
 0x1fc   :  { %v3111_v56 = vpack.c.bf16 %v869_v50, %v869_v50  ;;  %v810_v58 = vadd.f32 %v3291_v51, %v4297_v41 }
 0x1fd   :  { %v3293_v59 = vpop.f32.mrf.mxu1 }
 0x1fe   :  { %1142 = vst [vmem:[#allocation2 + $0x4] sm:$0xf] %v3111_v56  ;;  %v870_v20 = vmax.f32 %v810_v58, 0.0  ;;  %v3294_v60 = vadd.f32 %v3293_v59, %v3292_v55 }
 0x1ff   :  { %v3295_v62 = vpop.f32.mrf.mxu1 }
 0x200   :  { %v3112_v63 = vpack.c.bf16 %v870_v20, %v870_v20  ;;  %v815_v0 = vadd.f32 %v3294_v60, %v4297_v41  ;;  %v4302_v8 = vpack.c.bf16 %v870_v20, %v869_v50 }
 0x201   :  { %v3296_v9 = vpop.f32.mrf.mxu1 }
 0x202   :  { %1143 = vst [vmem:[#allocation2 + $0xc] sm:$0xf] %v3112_v63  ;;  %v871_v10 = vmax.f32 %v815_v0, 0.0  ;;  %v3297_v11 = vadd.f32 %v3296_v9, %v3295_v62 }
 0x203   :  { %v3298_v14 = vpop.f32.mrf.mxu1 }
 0x204   :  { %v3113_v15 = vpack.c.bf16 %v871_v10, %v871_v10  ;;  %v818_v16 = vadd.f32 %v3297_v11, %v4297_v41 }
 0x205   :  { %v3299_v18 = vpop.f32.mrf.mxu1 }
 0x206   :  { %1144 = vst [vmem:[#allocation2 + $0x14] sm:$0xf] %v3113_v15  ;;  %v872_v19 = vmax.f32 %v818_v16, 0.0  ;;  %v3300_v21 = vadd.f32 %v3299_v18, %v3298_v14 }
 0x207   :  { %v3301_v22 = vpop.f32.mrf.mxu1 }
 0x208   :  { %v3114_v23 = vpack.c.bf16 %v872_v19, %v872_v19  ;;  %v823_v24 = vadd.f32 %v3300_v21, %v4297_v41  ;;  %v4306_v26 = vpack.c.bf16 %v872_v19, %v871_v10 }
 0x209   :  { %v3302_v27 = vpop.f32.mrf.mxu1 }
 0x20a   :  { %1145 = vst [vmem:[#allocation2 + $0x1c] sm:$0xf] %v3114_v23  ;;  %v4308_v28 = vmax.f32 %v823_v24, 0.0  ;;  %v3303_v30 = vadd.f32 %v3302_v27, %v3301_v22 }
 0x20b   :  { %v3304_v31 = vpop.f32.mrf.mxu1 }
 0x20c   :  { %v3115_v32 = vpack.c.bf16 %v4308_v28, %v4308_v28  ;;  %v826_v33 = vadd.f32 %v3303_v30, %v4297_v41 }
 0x20d   :  { %v3305_v34 = vpop.f32.mrf.mxu1 }
 0x20e   :  { %1146 = vst [vmem:[#allocation2 + $0x24] sm:$0xf] %v3115_v32  ;;  %v4313_v35 = vmax.f32 %v826_v33, 0.0  ;;  %v3306_v38 = vadd.f32 %v3305_v34, %v3304_v31 }
 0x20f   :  { %v3307_v40 = vpop.f32.mrf.mxu1 }
 0x210   :  { %v3116_v43 = vpack.c.bf16 %v4313_v35, %v4313_v35  ;;  %v831_v44 = vadd.f32 %v3306_v38, %v4297_v41 }
 0x211   :  { %v3308_v45 = vpop.f32.mrf.mxu1 }
 0x212   :  { %1147 = vst [vmem:[#allocation2 + $0x2c] sm:$0xf] %v3116_v43  ;;  %v4318_v46 = vmax.f32 %v831_v44, 0.0  ;;  %v3309_v48 = vadd.f32 %v3308_v45, %v3307_v40 }
 0x213   :  { %v3310_v50 = vpop.f32.mrf.mxu1 }
 0x214   :  { %v3117_v51 = vpack.c.bf16 %v4318_v46, %v4318_v46  ;;  %v834_v55 = vadd.f32 %v3309_v48, %v4297_v41 }
 0x215   :  { %v3311_v56 = vpop.f32.mrf.mxu1 }
 0x216   :  { %1148 = vst [vmem:[#allocation2 + $0x34] sm:$0xf] %v3117_v51  ;;  %v4323_v58 = vmax.f32 %v834_v55, 0.0  ;;  %v3312_v59 = vadd.f32 %v3311_v56, %v3310_v50 }
 0x217   :  { %v3313_v20 = vpop.f32.mrf.mxu1 }
 0x218   :  { %v3118_v60 = vpack.c.bf16 %v4323_v58, %v4323_v58  ;;  %v839_v62 = vadd.f32 %v3312_v59, %v4297_v41 }
 0x219   :  { %v3314_v63 = vpop.f32.mrf.mxu1 }
 0x21a   :  { %1149 = vst [vmem:[#allocation2 + $0x3c] sm:$0xf] %v3118_v60  ;;  %v877_v0 = vmax.f32 %v839_v62, 0.0  ;;  %v3315_v9 = vadd.f32 %v3314_v63, %v3313_v20 }
 0x21b   :  { %v3316_v10 = vpop.f32.mrf.mxu1 }
 0x21c   :  { %v3119_v11 = vpack.c.bf16 %v877_v0, %v877_v0  ;;  %v842_v14 = vadd.f32 %v3315_v9, %v4297_v41 }
 0x21d   :  { %v3317_v15 = vpop.f32.mrf.mxu1 }
 0x21e   :  { %1150 = vst [vmem:[#allocation2 + $0x44] sm:$0xf] %v3119_v11  ;;  %v878_v16 = vmax.f32 %v842_v14, 0.0  ;;  %v3318_v18 = vadd.f32 %v3317_v15, %v3316_v10 }
 0x21f   :  { %v3319_v19 = vpop.f32.mrf.mxu1 }
 0x220   :  { %v3120_v21 = vpack.c.bf16 %v878_v16, %v878_v16  ;;  %v847_v22 = vadd.f32 %v3318_v18, %v4297_v41 }
 0x221   :  { %v3320_v23 = vpop.f32.mrf.mxu1 }
 0x222   :  { %1151 = vst [vmem:[#allocation2 + $0x4c] sm:$0xf] %v3120_v21  ;;  %v879_v24 = vmax.f32 %v847_v22, 0.0  ;;  %v3321_v27 = vadd.f32 %v3320_v23, %v3319_v19 }
 0x223   :  { %v3322_v30 = vpop.f32.mrf.mxu1 }
 0x224   :  { %v3121_v31 = vpack.c.bf16 %v879_v24, %v879_v24  ;;  %v850_v32 = vadd.f32 %v3321_v27, %v4297_v41 }
 0x225   :  { %v3323_v33 = vpop.f32.mrf.mxu1 }
 0x226   :  { %1152 = vst [vmem:[#allocation2 + $0x54] sm:$0xf] %v3121_v31  ;;  %v880_v34 = vmax.f32 %v850_v32, 0.0  ;;  %v3324_v38 = vadd.f32 %v3323_v33, %v3322_v30  ;;  %v889_v30 = vpack.c.bf16 %v878_v16, %v877_v0  ;;  %v888_v31 = vpack.c.bf16 %v4323_v58, %v4318_v46  ;;  %v3769_v0 = vld [vmem:[#allocation8 + $0x78] sm:$0xff]   ;;  %v3771_v46 = vld [vmem:[#allocation8 + $0x70] sm:$0xff]   ;;  %v3774_v58 = vld [vmem:[#allocation8 + $0x28] sm:$0xff]  }
 0x227   :  { %v3325_v40 = vpop.f32.mrf.mxu1  ;;  %v3770_v16 = vld [vmem:[#allocation8 + $0x38] sm:$0xff]   ;;  %v3780_v32 = vld [vmem:[#allocation8 + $0x10] sm:$0xff]  }
 0x228   :  { %v3122_v43 = vpack.c.bf16 %v880_v34, %v880_v34  ;;  %v855_v44 = vadd.f32 %v3324_v38, %v4297_v41  ;;  %v890_v27 = vpack.c.bf16 %v880_v34, %v879_v24  ;;  %v3779_v24 = vld [vmem:[#allocation8 + $0x50] sm:$0xff]  }
 0x229   :  { %v3326_v45 = vpop.f32.mrf.mxu1 }
 0x22a   :  { %1153 = vst [vmem:[#allocation2 + $0x5c] sm:$0xf] %v3122_v43  ;;  %v881_v48 = vmax.f32 %v855_v44, 0.0  ;;  %v3327_v50 = vadd.f32 %v3326_v45, %v3325_v40 }
 0x22b   :  { %v3328_v51 = vpop.f32.mrf.mxu1 }
 0x22c   :  { %v3123_v55 = vpack.c.bf16 %v881_v48, %v881_v48  ;;  %v858_v56 = vadd.f32 %v3327_v50, %v4297_v41 }
 0x22d   :  { %v3329_v59 = vpop.f32.mrf.mxu1 }
 0x22e   :  { %1154 = vst [vmem:[#allocation2 + $0x64] sm:$0xf] %v3123_v55  ;;  %v882_v20 = vmax.f32 %v858_v56, 0.0  ;;  %v3330_v60 = vadd.f32 %v3329_v59, %v3328_v51 }
 0x22f   :  { %v3331_v62 = vpop.f32.mrf.mxu1 }
 0x230   :  { %v3124_v63 = vpack.c.bf16 %v882_v20, %v882_v20  ;;  %v863_v9 = vadd.f32 %v3330_v60, %v4297_v41  ;;  %v891_v23 = vpack.c.bf16 %v882_v20, %v881_v48 }
 0x231   :  { %v3332_v10 = vpop.f32.mrf.mxu1 }
 0x232   :  { %1155 = vst [vmem:[#allocation2 + $0x6c] sm:$0xf] %v3124_v63  ;;  %v883_v11 = vmax.f32 %v863_v9, 0.0  ;;  %v3333_v14 = vadd.f32 %v3332_v10, %v3331_v62 }
 0x234   :  { %v3125_v15 = vpack.c.bf16 %v883_v11, %v883_v11  ;;  %v866_v18 = vadd.f32 %v3333_v14, %v4297_v41  ;;  %v887_v41 = vpack.c.bf16 %v4313_v35, %v4308_v28  ;;  %v3772_v28 = vld [vmem:[#allocation8 + $0x30] sm:$0xff]   ;;  %v3773_v35 = vld [vmem:[#allocation8 + $0x68] sm:$0xff]  }
 0x236   :  { %1156 = vst [vmem:[#allocation2 + $0x74] sm:$0xf] %v3125_v15  ;;  %v884_v19 = vmax.f32 %v866_v18, 0.0 }
 0x238   :  { %v3126_v21 = vpack.c.bf16 %v884_v19, %v884_v19  ;;  %v892_v22 = vpack.c.bf16 %v884_v19, %v883_v11 }
 0x23a   :  { %1157 = vst [vmem:[#allocation2 + $0x7c] sm:$0xf] %v3126_v21  ;;  %3606 = vmatprep.subr.bf16.mxu0 %v892_v22 }
 0x23b   :  { %3607 = vmatpush3.bf16.msra.mxu0 %v892_v22 }
 0x23c   :  { %3608 = vmatprep.subr.bf16.mxu0 %v891_v23 }
 0x23f   :  { %3609 = vmatpush3.bf16.msra.mxu0 %v891_v23  ;;  %v3785_v23 = vld [vmem:[#allocation2 + $0x4] ss:$8 sps:$4 sm:$0xff]  }
 0x240   :  { %3610 = vmatprep.subr.bf16.mxu0 %v890_v27 }
 0x243   :  { %3611 = vmatpush3.bf16.msra.mxu0 %v890_v27 }
 0x244   :  { %3612 = vmatprep.subr.bf16.mxu0 %v889_v30 }
 0x247   :  { %3613 = vmatpush3.bf16.msra.mxu0 %v889_v30 }
 0x248   :  { %3614 = vmatprep.subr.bf16.mxu0 %v888_v31 }
 0x24b   :  { %3615 = vmatpush3.bf16.msra.mxu0 %v888_v31 }
 0x24c   :  { %3616 = vmatprep.subr.bf16.mxu0 %v887_v41 }
 0x24f   :  { %3617 = vmatpush3.bf16.msra.mxu0 %v887_v41 }
 0x250   :  { %3618 = vmatprep.subr.bf16.mxu0 %v4306_v26 }
 0x253   :  { %3619 = vmatpush3.bf16.msra.mxu0 %v4306_v26  ;;  %v3778_v26 = vld [vmem:[#allocation8 + $0x18] sm:$0xff]  }
 0x254   :  { %3620 = vmatprep.subr.bf16.mxu0 %v4302_v8 }
 0x257   :  { %3621 = vmatpush3.bf16.msra.mxu0 %v4302_v8  ;;  %v3777_v8 = vld [vmem:[#allocation8 + $0x58] sm:$0xff]  }
 0x258   :  { %3350 = vmatprep.subr.bf16.mxu0 %v3769_v0  ;;  %v3788_v0 = vld [vmem:[#allocation2 + $0x14] ss:$8 sps:$4 sm:$0xff]  }
 0x25a   :  { %3623 = vmatmul.mubr.bf16.vlgmr.msra.gmra.mxu0 %v4158_v36  ;;  %v3775_v36 = vld [vmem:[#allocation8 + $0x60] sm:$0xff]  }
 0x25b   :  { %3626 = vmatprep.mubr.bf16.mxu0 %v4166_v39  ;;  %3351 = vmatpush3.bf16.msra.mxu0 %v3770_v16  ;;  %v3776_v39 = vld [vmem:[#allocation8 + $0x20] sm:$0xff]  }
 0x25c   :  { %3352 = vmatprep.subr.bf16.mxu0 %v3771_v46 }
 0x25f   :  { %3353 = vmatpush3.bf16.msra.mxu0 %v3772_v28 }
 0x260   :  { %3354 = vmatprep.subr.bf16.mxu0 %v3773_v35 }
 0x262   :  { %3627 = vmatmul.mubr.bf16.gmra.mxu0 %v4191_v47  ;;  %v3781_v47 = vld [vmem:[#allocation8 + $0x48] sm:$0xff]  }
 0x263   :  { %3630 = vmatprep.mubr.bf16.mxu0 %v4196_v49  ;;  %3355 = vmatpush3.bf16.msra.mxu0 %v3774_v58  ;;  %v3782_v49 = vld [vmem:[#allocation8 + $0x8] sm:$0xff]  }
 0x264   :  { %3356 = vmatprep.subr.bf16.mxu0 %v3775_v36 }
 0x267   :  { %3357 = vmatpush3.bf16.msra.mxu0 %v3776_v39 }
 0x268   :  { %3358 = vmatprep.subr.bf16.mxu0 %v3777_v8 }
 0x26a   :  { %3631 = vmatmul.mubr.bf16.gmra.mxu0 %v4206_v52  ;;  %v3783_v52 = vld [vmem:[#allocation8 + $0x40] sm:$0xff]  }
 0x26b   :  { %3634 = vmatprep.mubr.bf16.mxu0 %v4208_v53  ;;  %3359 = vmatpush3.bf16.msra.mxu0 %v3778_v26  ;;  %v3784_v53 = vld [vmem:[#allocation8] sm:$0xff]  }
 0x26c   :  { %3360 = vmatprep.subr.bf16.mxu0 %v3779_v24 }
 0x26f   :  { %3361 = vmatpush3.bf16.msra.mxu0 %v3780_v32 }
 0x270   :  { %3362 = vmatprep.subr.bf16.mxu0 %v3781_v47 }
 0x272   :  { %3635 = vmatmul.mubr.bf16.gmra.mxu0 %v4212_v54 }
 0x273   :  { %3363 = vmatpush3.bf16.msra.mxu0 %v3782_v49  ;;  %1421 = vmatprep.mubr.bf16.mxu0 %v3785_v23 }
 0x274   :  { %3364 = vmatprep.subr.bf16.mxu0 %v3783_v52  ;;  %v3791_v52 = vld [vmem:[#allocation2 + $0x24] ss:$8 sps:$4 sm:$0xff]  }
 0x277   :  { %3365 = vmatpush3.bf16.msra.mxu0 %v3784_v53 }
 0x31a   :  { %v3624_v54 = vpop.f32.mrf.mxu0 }
 0x31b   :  { %v992_v33 = vmul.f32 %v3624_v54, %v4247_v2 }
 0x31c   :  { %v927_v34 = vpop.f32.mrf.mxu0 }
 0x31d   :  { %v3097_v38 = vpack.c.bf16 %v992_v33, %v992_v33  ;;  %v990_v40 = vmul.f32 %v927_v34, %v4245_v1 }
 0x31e   :  { %v3625_v43 = vpop.f32.mrf.mxu0 }
 0x31f   :  { %1072 = vst [vmem:[#allocation2 + $0x10] sm:$0xf] %v3097_v38  ;;  %v3095_v44 = vpack.c.bf16 %v990_v40, %v990_v40  ;;  %v993_v45 = vmul.f32 %v3625_v43, %v4251_v4 }
 0x320   :  { %v930_v48 = vpop.f32.mrf.mxu0 }
 0x321   :  { %1070 = vst [vmem:[#allocation2] sm:$0xf] %v3095_v44  ;;  %v3098_v50 = vpack.c.bf16 %v993_v45, %v993_v45  ;;  %v991_v51 = vmul.f32 %v930_v48, %v4249_v3  ;;  %v3794_v44 = vld [vmem:[#allocation2 + $0x34] ss:$8 sps:$4 sm:$0xff]   ;;  %v3797_v48 = vld [vmem:[#allocation2 + $0x44] ss:$8 sps:$4 sm:$0xff]  }
 0x322   :  { %v3628_v55 = vpop.f32.mrf.mxu0 }
 0x323   :  { %1073 = vst [vmem:[#allocation2 + $0x18] sm:$0xf] %v3098_v50  ;;  %v3096_v56 = vpack.c.bf16 %v991_v51, %v991_v51  ;;  %v996_v59 = vmul.f32 %v3628_v55, %v4257_v7  ;;  %v3800_v51 = vld [vmem:[#allocation2 + $0x54] ss:$8 sps:$4 sm:$0xff]  }
 0x324   :  { %v943_v20 = vpop.f32.mrf.mxu0 }
 0x325   :  { %1071 = vst [vmem:[#allocation2 + $0x8] sm:$0xf] %v3096_v56  ;;  %v3101_v60 = vpack.c.bf16 %v996_v59, %v996_v59  ;;  %v994_v62 = vmul.f32 %v943_v20, %v4253_v5  ;;  %v3803_v56 = vld [vmem:[#allocation2 + $0x64] ss:$8 sps:$4 sm:$0xff]   ;;  %v3806_v20 = vld [vmem:[#allocation2 + $0x74] ss:$8 sps:$4 sm:$0xff]  }
 0x326   :  { %v3629_v63 = vpop.f32.mrf.mxu0 }
 0x327   :  { %1076 = vst [vmem:[#allocation2 + $0x30] sm:$0xf] %v3101_v60  ;;  %v3099_v9 = vpack.c.bf16 %v994_v62, %v994_v62  ;;  %v997_v10 = vmul.f32 %v3629_v63, %v4261_v13  ;;  %v3889_v62 = vld [vmem:[#allocation3] sm:$0xff]  }
 0x328   :  { %v946_v11 = vpop.f32.mrf.mxu0 }
 0x329   :  { %1074 = vst [vmem:[#allocation2 + $0x20] sm:$0xf] %v3099_v9  ;;  %v3102_v14 = vpack.c.bf16 %v997_v10, %v997_v10  ;;  %v995_v15 = vmul.f32 %v946_v11, %v4255_v6  ;;  %v4369_v9 = vld [vmem:[%s4552_s6] ss:$0 sm:$0xff] }
 0x32a   :  { %v3632_v18 = vpop.f32.mrf.mxu0  ;;  %v3790_v47 = vld [vmem:[#allocation2 + $0x10] ss:$8 sps:$4 sm:$0xff]  }
 0x32b   :  { %1077 = vst [vmem:[#allocation2 + $0x38] sm:$0xf] %v3102_v14  ;;  %v3100_v19 = vpack.c.bf16 %v995_v15, %v995_v15  ;;  %v1000_v21 = vmul.f32 %v3632_v18, %v4271_v29 }
 0x32c   :  { %v959_v22 = vpop.f32.mrf.mxu0  ;;  %v3787_v27 = vld [vmem:[#allocation2] ss:$8 sps:$4 sm:$0xff]  }
 0x32d   :  { %1075 = vst [vmem:[#allocation2 + $0x28] sm:$0xf] %v3100_v19  ;;  %v3105_v30 = vpack.c.bf16 %v1000_v21, %v1000_v21  ;;  %v998_v31 = vmul.f32 %v959_v22, %v4264_v17  ;;  %1422 = vmatmul.mubr.bf16.vlgmr.msra.gmra.mxu0 %v3787_v27 }
 0x32e   :  { %v3633_v41 = vpop.f32.mrf.mxu0  ;;  %1429 = vmatprep.mubr.bf16.mxu0 %v3788_v0 }
 0x32f   :  { %1080 = vst [vmem:[#allocation2 + $0x50] sm:$0xf] %v3105_v30  ;;  %v3103_v16 = vpack.c.bf16 %v998_v31, %v998_v31  ;;  %v1001_v46 = vmul.f32 %v3633_v41, %v4275_v37 }
 0x330   :  { %v962_v28 = vpop.f32.mrf.mxu0 }
 0x331   :  { %1078 = vst [vmem:[#allocation2 + $0x40] sm:$0xf] %v3103_v16  ;;  %v3106_v35 = vpack.c.bf16 %v1001_v46, %v1001_v46  ;;  %v999_v58 = vmul.f32 %v962_v28, %v4268_v25 }
 0x332   :  { %v3636_v36 = vpop.f32.mrf.mxu0  ;;  %v3796_v45 = vld [vmem:[#allocation2 + $0x30] ss:$8 sps:$4 sm:$0xff]  }
 0x333   :  { %1081 = vst [vmem:[#allocation2 + $0x58] sm:$0xf] %v3106_v35  ;;  %v3104_v39 = vpack.c.bf16 %v999_v58, %v999_v58  ;;  %v1004_v8 = vmul.f32 %v3636_v36, %v4285_v61 }
 0x334   :  { %v975_v26 = vpop.f32.mrf.mxu0  ;;  %v3793_v43 = vld [vmem:[#allocation2 + $0x20] ss:$8 sps:$4 sm:$0xff]  }
 0x335   :  { %1079 = vst [vmem:[#allocation2 + $0x48] sm:$0xf] %v3104_v39  ;;  %v3109_v24 = vpack.c.bf16 %v1004_v8, %v1004_v8  ;;  %v1002_v32 = vmul.f32 %v975_v26, %v4278_v42  ;;  %1430 = vmatmul.mubr.bf16.gmra.mxu0 %v3790_v47 }
 0x336   :  { %v3637_v49 = vpop.f32.mrf.mxu0  ;;  %1437 = vmatprep.mubr.bf16.mxu0 %v3791_v52 }
 0x337   :  { %1084 = vst [vmem:[#allocation2 + $0x70] sm:$0xf] %v3109_v24  ;;  %v3107_v53 = vpack.c.bf16 %v1002_v32, %v1002_v32  ;;  %v1005_v54 = vmul.f32 %v3637_v49, %v4289_v12 }
 0x338   :  { %v978_v33 = vpop.f32.mrf.mxu0 }
 0x339   :  { %1082 = vst [vmem:[#allocation2 + $0x60] sm:$0xf] %v3107_v53  ;;  %v3110_v34 = vpack.c.bf16 %v1005_v54, %v1005_v54  ;;  %v1003_v38 = vmul.f32 %v978_v33, %v4282_v57 }
 0x33a   :  { %v3802_v55 = vld [vmem:[#allocation2 + $0x50] ss:$8 sps:$4 sm:$0xff]  }
 0x33b   :  { %1085 = vst [vmem:[#allocation2 + $0x78] sm:$0xf] %v3110_v34  ;;  %v3108_v40 = vpack.c.bf16 %v1003_v38, %v1003_v38 }
 0x33c   :  { %v3799_v50 = vld [vmem:[#allocation2 + $0x40] ss:$8 sps:$4 sm:$0xff]  }
 0x33d   :  { %1083 = vst [vmem:[#allocation2 + $0x68] sm:$0xf] %v3108_v40  ;;  %1438 = vmatmul.mubr.bf16.gmra.mxu0 %v3793_v43 }
 0x33e   :  { %1445 = vmatprep.mubr.bf16.mxu0 %v3794_v44 }
 0x342   :  { %v3808_v60 = vld [vmem:[#allocation2 + $0x70] ss:$8 sps:$4 sm:$0xff]  }
 0x344   :  { %v3805_v59 = vld [vmem:[#allocation2 + $0x60] ss:$8 sps:$4 sm:$0xff]  }
 0x345   :  { %1446 = vmatmul.mubr.bf16.gmra.mxu0 %v3796_v45 }
 0x346   :  { %1453 = vmatprep.mubr.bf16.mxu0 %v3797_v48 }
 0x34d   :  { %1454 = vmatmul.mubr.bf16.gmra.mxu0 %v3799_v50 }
 0x34e   :  { %1461 = vmatprep.mubr.bf16.mxu0 %v3800_v51 }
 0x355   :  { %1462 = vmatmul.mubr.bf16.gmra.mxu0 %v3802_v55 }
 0x356   :  { %1469 = vmatprep.mubr.bf16.mxu0 %v3803_v56 }
 0x35d   :  { %1470 = vmatmul.mubr.bf16.gmra.mxu0 %v3805_v59 }
 0x35e   :  { %1477 = vmatprep.mubr.bf16.mxu0 %v3806_v20 }
 0x365   :  { %1478 = vmatmul.mubr.bf16.gmra.mxu0 %v3808_v60 }
 0x366   :  { %3686 = vmatprep.mubr.bf16.mxu0 %v3889_v62 }
 0x3ed   :  { %v3366_v63 = vpop.f32.mrf.mxu0 }
 0x3ef   :  { %v3367_v10 = vpop.f32.mrf.mxu0 }
 0x3f0   :  { %v3368_v11 = vadd.f32 %v3367_v10, %v3366_v63 }
 0x3f1   :  { %v3369_v14 = vpop.f32.mrf.mxu0 }
 0x3f2   :  { %v1424_v15 = vadd.f32 %v3368_v11, %v4369_v9 }
 0x3f3   :  { %v3370_v18 = vpop.f32.mrf.mxu0 }
 0x3f4   :  { %v3143_v19 = vpack.c.bf16 %v1424_v15, %v1424_v15  ;;  %v3371_v21 = vadd.f32 %v3370_v18, %v3369_v14 }
 0x3f5   :  { %v3372_v22 = vpop.f32.mrf.mxu0 }
 0x3f6   :  { %1743 = vst [vmem:[#allocation2 + $0x4] sm:$0xf] %v3143_v19  ;;  %v1427_v23 = vadd.f32 %v3371_v21, %v4369_v9 }
 0x3f7   :  { %v3373_v27 = vpop.f32.mrf.mxu0 }
 0x3f8   :  { %v3144_v30 = vpack.c.bf16 %v1427_v23, %v1427_v23  ;;  %v3374_v31 = vadd.f32 %v3373_v27, %v3372_v22  ;;  %v4373_v41 = vpack.c.bf16 %v1427_v23, %v1424_v15 }
 0x3f9   :  { %v3375_v0 = vpop.f32.mrf.mxu0 }
 0x3fa   :  { %1744 = vst [vmem:[#allocation2 + $0xc] sm:$0xf] %v3144_v30  ;;  %v1432_v16 = vadd.f32 %v3374_v31, %v4369_v9 }
 0x3fb   :  { %v3376_v46 = vpop.f32.mrf.mxu0 }
 0x3fc   :  { %v3145_v28 = vpack.c.bf16 %v1432_v16, %v1432_v16  ;;  %v3377_v35 = vadd.f32 %v3376_v46, %v3375_v0 }
 0x3fd   :  { %v3378_v58 = vpop.f32.mrf.mxu0 }
 0x3fe   :  { %1745 = vst [vmem:[#allocation2 + $0x14] sm:$0xf] %v3145_v28  ;;  %v1435_v36 = vadd.f32 %v3377_v35, %v4369_v9 }
 0x3ff   :  { %v3379_v39 = vpop.f32.mrf.mxu0 }
 0x400   :  { %v3146_v8 = vpack.c.bf16 %v1435_v36, %v1435_v36  ;;  %v3380_v26 = vadd.f32 %v3379_v39, %v3378_v58  ;;  %v4377_v24 = vpack.c.bf16 %v1435_v36, %v1432_v16 }
 0x401   :  { %v3381_v32 = vpop.f32.mrf.mxu0 }
 0x402   :  { %1746 = vst [vmem:[#allocation2 + $0x1c] sm:$0xf] %v3146_v8  ;;  %v4380_v47 = vadd.f32 %v3380_v26, %v4369_v9 }
 0x403   :  { %v3382_v49 = vpop.f32.mrf.mxu0 }
 0x404   :  { %v3147_v52 = vpack.c.bf16 %v4380_v47, %v4380_v47  ;;  %v3383_v53 = vadd.f32 %v3382_v49, %v3381_v32 }
 0x405   :  { %v3384_v54 = vpop.f32.mrf.mxu0 }
 0x406   :  { %1747 = vst [vmem:[#allocation2 + $0x24] sm:$0xf] %v3147_v52  ;;  %v4385_v33 = vadd.f32 %v3383_v53, %v4369_v9 }
 0x407   :  { %v3385_v34 = vpop.f32.mrf.mxu0 }
 0x408   :  { %v3148_v38 = vpack.c.bf16 %v4385_v33, %v4385_v33  ;;  %v3386_v40 = vadd.f32 %v3385_v34, %v3384_v54 }
 0x409   :  { %v3387_v43 = vpop.f32.mrf.mxu0 }
 0x40a   :  { %1748 = vst [vmem:[#allocation2 + $0x2c] sm:$0xf] %v3148_v38  ;;  %v4390_v44 = vadd.f32 %v3386_v40, %v4369_v9 }
 0x40b   :  { %v3388_v45 = vpop.f32.mrf.mxu0 }
 0x40c   :  { %v3149_v48 = vpack.c.bf16 %v4390_v44, %v4390_v44  ;;  %v3389_v50 = vadd.f32 %v3388_v45, %v3387_v43 }
 0x40d   :  { %v3390_v51 = vpop.f32.mrf.mxu0 }
 0x40e   :  { %1749 = vst [vmem:[#allocation2 + $0x34] sm:$0xf] %v3149_v48  ;;  %v1451_v55 = vadd.f32 %v3389_v50, %v4369_v9 }
 0x40f   :  { %v3391_v56 = vpop.f32.mrf.mxu0 }
 0x410   :  { %v3150_v59 = vpack.c.bf16 %v1451_v55, %v1451_v55  ;;  %v3392_v20 = vadd.f32 %v3391_v56, %v3390_v51 }
 0x411   :  { %v3393_v60 = vpop.f32.mrf.mxu0 }
 0x412   :  { %1750 = vst [vmem:[#allocation2 + $0x3c] sm:$0xf] %v3150_v59  ;;  %v1456_v62 = vadd.f32 %v3392_v20, %v4369_v9 }
 0x413   :  { %v3394_v63 = vpop.f32.mrf.mxu0 }
 0x414   :  { %v3151_v10 = vpack.c.bf16 %v1456_v62, %v1456_v62  ;;  %v3395_v11 = vadd.f32 %v3394_v63, %v3393_v60  ;;  %v1489_v60 = vpack.c.bf16 %v1451_v55, %v4390_v44  ;;  %v3809_v63 = vld [vmem:[#allocation9 + $0x78] sm:$0xff]   ;;  %v3811_v44 = vld [vmem:[#allocation9 + $0x70] sm:$0xff]   ;;  %v4410_v55 = vld [vmem:[#allocation3 + $0x8] sm:$0xff]  }
 0x415   :  { %v3396_v14 = vpop.f32.mrf.mxu0 }
 0x416   :  { %1751 = vst [vmem:[#allocation2 + $0x44] sm:$0xf] %v3151_v10  ;;  %v1459_v15 = vadd.f32 %v3395_v11, %v4369_v9  ;;  %v3814_v10 = vld [vmem:[#allocation9 + $0x28] sm:$0xff]   ;;  %v4416_v11 = vld [vmem:[#allocation3 + $0x18] sm:$0xff]  }
 0x417   :  { %v3397_v18 = vpop.f32.mrf.mxu0 }
 0x418   :  { %v3152_v19 = vpack.c.bf16 %v1459_v15, %v1459_v15  ;;  %v3398_v21 = vadd.f32 %v3397_v18, %v3396_v14  ;;  %v1490_v20 = vpack.c.bf16 %v1459_v15, %v1456_v62  ;;  %v3810_v62 = vld [vmem:[#allocation9 + $0x38] sm:$0xff]   ;;  %v4422_v14 = vld [vmem:[#allocation3 + $0x28] sm:$0xff]   ;;  %v4425_v15 = vld [vmem:[#allocation3 + $0x30] sm:$0xff]  }
 0x419   :  { %v3399_v22 = vpop.f32.mrf.mxu0  ;;  %v4428_v18 = vld [vmem:[#allocation3 + $0x38] sm:$0xff]  }
 0x41a   :  { %1752 = vst [vmem:[#allocation2 + $0x4c] sm:$0xf] %v3152_v19  ;;  %v1464_v23 = vadd.f32 %v3398_v21, %v4369_v9  ;;  %v3815_v19 = vld [vmem:[#allocation9 + $0x60] sm:$0xff]  }
 0x41b   :  { %v3400_v27 = vpop.f32.mrf.mxu0  ;;  %v3816_v21 = vld [vmem:[#allocation9 + $0x20] sm:$0xff]  }
 0x41c   :  { %v3153_v30 = vpack.c.bf16 %v1464_v23, %v1464_v23  ;;  %v3401_v31 = vadd.f32 %v3400_v27, %v3399_v22  ;;  %v3817_v22 = vld [vmem:[#allocation9 + $0x58] sm:$0xff]   ;;  %v3819_v27 = vld [vmem:[#allocation9 + $0x50] sm:$0xff]  }
 0x41d   :  { %v3402_v0 = vpop.f32.mrf.mxu0 }
 0x41e   :  { %1753 = vst [vmem:[#allocation2 + $0x54] sm:$0xf] %v3153_v30  ;;  %v1467_v16 = vadd.f32 %v3401_v31, %v4369_v9  ;;  %v3820_v30 = vld [vmem:[#allocation9 + $0x10] sm:$0xff]   ;;  %v3821_v31 = vld [vmem:[#allocation9 + $0x48] sm:$0xff]  }
 0x41f   :  { %v3403_v46 = vpop.f32.mrf.mxu0 }
 0x420   :  { %v3154_v28 = vpack.c.bf16 %v1467_v16, %v1467_v16  ;;  %v3404_v35 = vadd.f32 %v3403_v46, %v3402_v0  ;;  %v1491_v59 = vpack.c.bf16 %v1467_v16, %v1464_v23  ;;  %v3818_v23 = vld [vmem:[#allocation9 + $0x18] sm:$0xff]   ;;  %v3822_v0 = vld [vmem:[#allocation9 + $0x8] sm:$0xff]   ;;  %v3823_v16 = vld [vmem:[#allocation9 + $0x40] sm:$0xff]  }
 0x421   :  { %v3405_v58 = vpop.f32.mrf.mxu0  ;;  %v3824_v46 = vld [vmem:[#allocation9] sm:$0xff]  }
 0x422   :  { %1754 = vst [vmem:[#allocation2 + $0x5c] sm:$0xf] %v3154_v28  ;;  %v1472_v36 = vadd.f32 %v3404_v35, %v4369_v9 }
 0x423   :  { %v3406_v39 = vpop.f32.mrf.mxu0 }
 0x424   :  { %v3155_v8 = vpack.c.bf16 %v1472_v36, %v1472_v36  ;;  %v3407_v26 = vadd.f32 %v3406_v39, %v3405_v58 }
 0x425   :  { %v3408_v32 = vpop.f32.mrf.mxu0 }
 0x426   :  { %1755 = vst [vmem:[#allocation2 + $0x64] sm:$0xf] %v3155_v8  ;;  %v1475_v49 = vadd.f32 %v3407_v26, %v4369_v9 }
 0x427   :  { %v3409_v52 = vpop.f32.mrf.mxu0 }
 0x428   :  { %v3156_v53 = vpack.c.bf16 %v1475_v49, %v1475_v49  ;;  %v3410_v54 = vadd.f32 %v3409_v52, %v3408_v32  ;;  %v1492_v56 = vpack.c.bf16 %v1475_v49, %v1472_v36 }
 0x429   :  { %v3411_v34 = vpop.f32.mrf.mxu0 }
 0x42a   :  { %1756 = vst [vmem:[#allocation2 + $0x6c] sm:$0xf] %v3156_v53  ;;  %v1480_v38 = vadd.f32 %v3410_v54, %v4369_v9 }
 0x42b   :  { %v3412_v40 = vpop.f32.mrf.mxu0 }
 0x42c   :  { %v3157_v43 = vpack.c.bf16 %v1480_v38, %v1480_v38  ;;  %v3413_v45 = vadd.f32 %v3412_v40, %v3411_v34 }
 0x42e   :  { %1757 = vst [vmem:[#allocation2 + $0x74] sm:$0xf] %v3157_v43  ;;  %v1483_v48 = vadd.f32 %v3413_v45, %v4369_v9  ;;  %v1488_v9 = vpack.c.bf16 %v4385_v33, %v4380_v47  ;;  %v4413_v47 = vld [vmem:[#allocation3 + $0x10] sm:$0xff]  }
 0x42f   :  { %v3812_v33 = vld [vmem:[#allocation9 + $0x30] sm:$0xff]  }
 0x430   :  { %v3158_v50 = vpack.c.bf16 %v1483_v48, %v1483_v48  ;;  %v1493_v51 = vpack.c.bf16 %v1483_v48, %v1480_v38 }
 0x432   :  { %1758 = vst [vmem:[#allocation2 + $0x7c] sm:$0xf] %v3158_v50  ;;  %3638 = vmatprep.subr.bf16.mxu1 %v1493_v51 }
 0x433   :  { %3639 = vmatpush3.bf16.msra.mxu1 %v1493_v51 }
 0x434   :  { %3640 = vmatprep.subr.bf16.mxu1 %v1492_v56 }
 0x437   :  { %3641 = vmatpush3.bf16.msra.mxu1 %v1492_v56 }
 0x438   :  { %3642 = vmatprep.subr.bf16.mxu1 %v1491_v59 }
 0x43b   :  { %3643 = vmatpush3.bf16.msra.mxu1 %v1491_v59 }
 0x43c   :  { %3644 = vmatprep.subr.bf16.mxu1 %v1490_v20 }
 0x43f   :  { %3645 = vmatpush3.bf16.msra.mxu1 %v1490_v20 }
 0x440   :  { %3646 = vmatprep.subr.bf16.mxu1 %v1489_v60 }
 0x443   :  { %3647 = vmatpush3.bf16.msra.mxu1 %v1489_v60 }
 0x444   :  { %3648 = vmatprep.subr.bf16.mxu1 %v1488_v9 }
 0x447   :  { %3649 = vmatpush3.bf16.msra.mxu1 %v1488_v9 }
 0x448   :  { %3650 = vmatprep.subr.bf16.mxu1 %v4377_v24 }
 0x44b   :  { %3651 = vmatpush3.bf16.msra.mxu1 %v4377_v24  ;;  %v3813_v24 = vld [vmem:[#allocation9 + $0x68] sm:$0xff]  }
 0x44c   :  { %3652 = vmatprep.subr.bf16.mxu1 %v4373_v41 }
 0x44f   :  { %3653 = vmatpush3.bf16.msra.mxu1 %v4373_v41  ;;  %v4419_v41 = vld [vmem:[#allocation3 + $0x20] sm:$0xff]  }
 0x450   :  { %3430 = vmatprep.subr.bf16.mxu1 %v3809_v63 }
 0x452   :  { %3655 = vmatmul.mubr.bf16.vlgmr.msra.gmra.mxu1 %v4410_v55 }
 0x453   :  { %3658 = vmatprep.mubr.bf16.mxu1 %v4413_v47  ;;  %3431 = vmatpush3.bf16.msra.mxu1 %v3810_v62 }
 0x454   :  { %3432 = vmatprep.subr.bf16.mxu1 %v3811_v44  ;;  %v3825_v44 = vld [vmem:[#allocation2 + $0x4] ss:$8 sps:$4 sm:$0xff]  }
 0x457   :  { %3433 = vmatpush3.bf16.msra.mxu1 %v3812_v33 }
 0x458   :  { %3434 = vmatprep.subr.bf16.mxu1 %v3813_v24 }
 0x45a   :  { %3659 = vmatmul.mubr.bf16.gmra.mxu1 %v4416_v11 }
 0x45b   :  { %3662 = vmatprep.mubr.bf16.mxu1 %v4419_v41  ;;  %3435 = vmatpush3.bf16.msra.mxu1 %v3814_v10 }
 0x45c   :  { %3436 = vmatprep.subr.bf16.mxu1 %v3815_v19 }
 0x45f   :  { %3437 = vmatpush3.bf16.msra.mxu1 %v3816_v21  ;;  %v3828_v21 = vld [vmem:[#allocation2 + $0x14] ss:$8 sps:$4 sm:$0xff]  }
 0x460   :  { %3438 = vmatprep.subr.bf16.mxu1 %v3817_v22 }
 0x462   :  { %3663 = vmatmul.mubr.bf16.gmra.mxu1 %v4422_v14 }
 0x463   :  { %3666 = vmatprep.mubr.bf16.mxu1 %v4425_v15  ;;  %3439 = vmatpush3.bf16.msra.mxu1 %v3818_v23 }
 0x464   :  { %3440 = vmatprep.subr.bf16.mxu1 %v3819_v27 }
 0x467   :  { %3441 = vmatpush3.bf16.msra.mxu1 %v3820_v30 }
 0x468   :  { %3442 = vmatprep.subr.bf16.mxu1 %v3821_v31 }
 0x46a   :  { %3667 = vmatmul.mubr.bf16.gmra.mxu1 %v4428_v18 }
 0x46b   :  { %3443 = vmatpush3.bf16.msra.mxu1 %v3822_v0  ;;  %2022 = vmatprep.mubr.bf16.mxu1 %v3825_v44 }
 0x46c   :  { %3444 = vmatprep.subr.bf16.mxu1 %v3823_v16 }
 0x46f   :  { %3445 = vmatpush3.bf16.msra.mxu1 %v3824_v46 }
 0x512   :  { %v3656_v28 = vpop.f32.mrf.mxu1 }
 0x513   :  { %v1593_v35 = vmul.f32 %v3656_v28, %v4247_v2 }
 0x514   :  { %v1528_v58 = vpop.f32.mrf.mxu1 }
 0x515   :  { %v3129_v36 = vpack.c.bf16 %v1593_v35, %v1593_v35  ;;  %v1591_v39 = vmul.f32 %v1528_v58, %v4245_v1 }
 0x516   :  { %v3657_v8 = vpop.f32.mrf.mxu1 }
 0x517   :  { %1673 = vst [vmem:[#allocation2 + $0x10] sm:$0xf] %v3129_v36  ;;  %v3127_v26 = vpack.c.bf16 %v1591_v39, %v1591_v39  ;;  %v1594_v32 = vmul.f32 %v3657_v8, %v4251_v4  ;;  %v3831_v8 = vld [vmem:[#allocation2 + $0x24] ss:$8 sps:$4 sm:$0xff]  }
 0x518   :  { %v1531_v49 = vpop.f32.mrf.mxu1 }
 0x519   :  { %1671 = vst [vmem:[#allocation2] sm:$0xf] %v3127_v26  ;;  %v3130_v52 = vpack.c.bf16 %v1594_v32, %v1594_v32  ;;  %v1592_v53 = vmul.f32 %v1531_v49, %v4249_v3 }
 0x51a   :  { %v3660_v54 = vpop.f32.mrf.mxu1 }
 0x51b   :  { %1674 = vst [vmem:[#allocation2 + $0x18] sm:$0xf] %v3130_v52  ;;  %v3128_v34 = vpack.c.bf16 %v1592_v53, %v1592_v53  ;;  %v1597_v38 = vmul.f32 %v3660_v54, %v4257_v7 }
 0x51c   :  { %v1544_v40 = vpop.f32.mrf.mxu1 }
 0x51d   :  { %1672 = vst [vmem:[#allocation2 + $0x8] sm:$0xf] %v3128_v34  ;;  %v3133_v43 = vpack.c.bf16 %v1597_v38, %v1597_v38  ;;  %v1595_v45 = vmul.f32 %v1544_v40, %v4253_v5  ;;  %v3834_v38 = vld [vmem:[#allocation2 + $0x34] ss:$8 sps:$4 sm:$0xff]  }
 0x51e   :  { %v3661_v48 = vpop.f32.mrf.mxu1 }
 0x51f   :  { %1677 = vst [vmem:[#allocation2 + $0x30] sm:$0xf] %v3133_v43  ;;  %v3131_v50 = vpack.c.bf16 %v1595_v45, %v1595_v45  ;;  %v1598_v51 = vmul.f32 %v3661_v48, %v4261_v13  ;;  %v3837_v43 = vld [vmem:[#allocation2 + $0x44] ss:$8 sps:$4 sm:$0xff]   ;;  %v3840_v48 = vld [vmem:[#allocation2 + $0x54] ss:$8 sps:$4 sm:$0xff]  }
 0x520   :  { %v1547_v56 = vpop.f32.mrf.mxu1 }
 0x521   :  { %1675 = vst [vmem:[#allocation2 + $0x20] sm:$0xf] %v3131_v50  ;;  %v3134_v59 = vpack.c.bf16 %v1598_v51, %v1598_v51  ;;  %v1596_v20 = vmul.f32 %v1547_v56, %v4255_v6  ;;  %v3843_v51 = vld [vmem:[#allocation2 + $0x64] ss:$8 sps:$4 sm:$0xff]  }
 0x522   :  { %v3664_v60 = vpop.f32.mrf.mxu1  ;;  %v3830_v36 = vld [vmem:[#allocation2 + $0x10] ss:$8 sps:$4 sm:$0xff]  }
 0x523   :  { %1678 = vst [vmem:[#allocation2 + $0x38] sm:$0xf] %v3134_v59  ;;  %v3132_v9 = vpack.c.bf16 %v1596_v20, %v1596_v20  ;;  %v1601_v63 = vmul.f32 %v3664_v60, %v4271_v29  ;;  %v3846_v59 = vld [vmem:[#allocation2 + $0x74] ss:$8 sps:$4 sm:$0xff]  }
 0x524   :  { %v1560_v62 = vpop.f32.mrf.mxu1  ;;  %v3827_v33 = vld [vmem:[#allocation2] ss:$8 sps:$4 sm:$0xff]  }
 0x525   :  { %1676 = vst [vmem:[#allocation2 + $0x28] sm:$0xf] %v3132_v9  ;;  %v3137_v24 = vpack.c.bf16 %v1601_v63, %v1601_v63  ;;  %v1599_v10 = vmul.f32 %v1560_v62, %v4264_v17  ;;  %2023 = vmatmul.mubr.bf16.vlgmr.msra.gmra.mxu1 %v3827_v33  ;;  %v4450_v9 = vld [vmem:[%s4554_s8] ss:$0 sm:$0xff] }
 0x526   :  { %v3665_v19 = vpop.f32.mrf.mxu1  ;;  %2030 = vmatprep.mubr.bf16.mxu1 %v3828_v21 }
 0x527   :  { %1681 = vst [vmem:[#allocation2 + $0x50] sm:$0xf] %v3137_v24  ;;  %v3135_v22 = vpack.c.bf16 %v1599_v10, %v1599_v10  ;;  %v1602_v23 = vmul.f32 %v3665_v19, %v4275_v37 }
 0x528   :  { %v1563_v27 = vpop.f32.mrf.mxu1 }
 0x529   :  { %1679 = vst [vmem:[#allocation2 + $0x40] sm:$0xf] %v3135_v22  ;;  %v3138_v30 = vpack.c.bf16 %v1602_v23, %v1602_v23  ;;  %v1600_v31 = vmul.f32 %v1563_v27, %v4268_v25 }
 0x52a   :  { %v3668_v0 = vpop.f32.mrf.mxu1  ;;  %v3836_v40 = vld [vmem:[#allocation2 + $0x30] ss:$8 sps:$4 sm:$0xff]  }
 0x52b   :  { %1682 = vst [vmem:[#allocation2 + $0x58] sm:$0xf] %v3138_v30  ;;  %v3136_v16 = vpack.c.bf16 %v1600_v31, %v1600_v31  ;;  %v1605_v46 = vmul.f32 %v3668_v0, %v4285_v61 }
 0x52c   :  { %v1576_v28 = vpop.f32.mrf.mxu1  ;;  %v3833_v34 = vld [vmem:[#allocation2 + $0x20] ss:$8 sps:$4 sm:$0xff]  }
 0x52d   :  { %1680 = vst [vmem:[#allocation2 + $0x48] sm:$0xf] %v3136_v16  ;;  %v3141_v35 = vpack.c.bf16 %v1605_v46, %v1605_v46  ;;  %v1603_v58 = vmul.f32 %v1576_v28, %v4278_v42  ;;  %2031 = vmatmul.mubr.bf16.gmra.mxu1 %v3830_v36 }
 0x52e   :  { %v3669_v39 = vpop.f32.mrf.mxu1  ;;  %2038 = vmatprep.mubr.bf16.mxu1 %v3831_v8 }
 0x52f   :  { %1685 = vst [vmem:[#allocation2 + $0x70] sm:$0xf] %v3141_v35  ;;  %v3139_v26 = vpack.c.bf16 %v1603_v58, %v1603_v58  ;;  %v1606_v32 = vmul.f32 %v3669_v39, %v4289_v12 }
 0x530   :  { %v1579_v49 = vpop.f32.mrf.mxu1 }
 0x531   :  { %1683 = vst [vmem:[#allocation2 + $0x60] sm:$0xf] %v3139_v26  ;;  %v3142_v52 = vpack.c.bf16 %v1606_v32, %v1606_v32  ;;  %v1604_v53 = vmul.f32 %v1579_v49, %v4282_v57 }
 0x532   :  { %v3842_v50 = vld [vmem:[#allocation2 + $0x50] ss:$8 sps:$4 sm:$0xff]  }
 0x533   :  { %1686 = vst [vmem:[#allocation2 + $0x78] sm:$0xf] %v3142_v52  ;;  %v3140_v54 = vpack.c.bf16 %v1604_v53, %v1604_v53 }
 0x534   :  { %v3839_v45 = vld [vmem:[#allocation2 + $0x40] ss:$8 sps:$4 sm:$0xff]  }
 0x535   :  { %1684 = vst [vmem:[#allocation2 + $0x68] sm:$0xf] %v3140_v54  ;;  %2039 = vmatmul.mubr.bf16.gmra.mxu1 %v3833_v34 }
 0x536   :  { %2046 = vmatprep.mubr.bf16.mxu1 %v3834_v38 }
 0x53a   :  { %v3848_v20 = vld [vmem:[#allocation2 + $0x70] ss:$8 sps:$4 sm:$0xff]  }
 0x53c   :  { %v3845_v56 = vld [vmem:[#allocation2 + $0x60] ss:$8 sps:$4 sm:$0xff]  }
 0x53d   :  { %2047 = vmatmul.mubr.bf16.gmra.mxu1 %v3836_v40 }
 0x53e   :  { %2054 = vmatprep.mubr.bf16.mxu1 %v3837_v43 }
 0x545   :  { %2055 = vmatmul.mubr.bf16.gmra.mxu1 %v3839_v45 }
 0x546   :  { %2062 = vmatprep.mubr.bf16.mxu1 %v3840_v48 }
 0x54d   :  { %2063 = vmatmul.mubr.bf16.gmra.mxu1 %v3842_v50 }
 0x54e   :  { %2070 = vmatprep.mubr.bf16.mxu1 %v3843_v51 }
 0x555   :  { %2071 = vmatmul.mubr.bf16.gmra.mxu1 %v3845_v56 }
 0x556   :  { %2078 = vmatprep.mubr.bf16.mxu1 %v3846_v59 }
 0x55d   :  { %2079 = vmatmul.mubr.bf16.gmra.mxu1 %v3848_v20 }
 0x5e5   :  { %v3446_v60 = vpop.f32.mrf.mxu1 }
 0x5e7   :  { %v3447_v63 = vpop.f32.mrf.mxu1 }
 0x5e8   :  { %v3448_v62 = vadd.f32 %v3447_v63, %v3446_v60 }
 0x5e9   :  { %v3449_v44 = vpop.f32.mrf.mxu1 }
 0x5ea   :  { %v2025_v33 = vadd.f32 %v3448_v62, %v4450_v9 }
 0x5eb   :  { %v3450_v24 = vpop.f32.mrf.mxu1 }
 0x5ec   :  { %v2087_v10 = vmax.f32 %v2025_v33, 0.0  ;;  %v3451_v19 = vadd.f32 %v3450_v24, %v3449_v44 }
 0x5ed   :  { %v3452_v21 = vpop.f32.mrf.mxu1 }
 0x5ee   :  { %v3175_v22 = vpack.c.bf16 %v2087_v10, %v2087_v10  ;;  %v2028_v23 = vadd.f32 %v3451_v19, %v4450_v9 }
 0x5ef   :  { %v3453_v27 = vpop.f32.mrf.mxu1 }
 0x5f0   :  { %2360 = vst [vmem:[#allocation2 + $0x4] sm:$0xf] %v3175_v22  ;;  %v2088_v30 = vmax.f32 %v2028_v23, 0.0  ;;  %v3454_v31 = vadd.f32 %v3453_v27, %v3452_v21 }
 0x5f1   :  { %v3455_v0 = vpop.f32.mrf.mxu1 }
 0x5f2   :  { %v3176_v16 = vpack.c.bf16 %v2088_v30, %v2088_v30  ;;  %v2033_v46 = vadd.f32 %v3454_v31, %v4450_v9  ;;  %v4455_v28 = vpack.c.bf16 %v2088_v30, %v2087_v10 }
 0x5f3   :  { %v3456_v35 = vpop.f32.mrf.mxu1 }
 0x5f4   :  { %2361 = vst [vmem:[#allocation2 + $0xc] sm:$0xf] %v3176_v16  ;;  %v2089_v58 = vmax.f32 %v2033_v46, 0.0  ;;  %v3457_v36 = vadd.f32 %v3456_v35, %v3455_v0 }
 0x5f5   :  { %v3458_v39 = vpop.f32.mrf.mxu1 }
 0x5f6   :  { %v3177_v8 = vpack.c.bf16 %v2089_v58, %v2089_v58  ;;  %v2036_v26 = vadd.f32 %v3457_v36, %v4450_v9 }
 0x5f7   :  { %v3459_v32 = vpop.f32.mrf.mxu1 }
 0x5f8   :  { %2362 = vst [vmem:[#allocation2 + $0x14] sm:$0xf] %v3177_v8  ;;  %v2090_v49 = vmax.f32 %v2036_v26, 0.0  ;;  %v3460_v52 = vadd.f32 %v3459_v32, %v3458_v39 }
 0x5f9   :  { %v3461_v53 = vpop.f32.mrf.mxu1 }
 0x5fa   :  { %v3178_v54 = vpack.c.bf16 %v2090_v49, %v2090_v49  ;;  %v2041_v34 = vadd.f32 %v3460_v52, %v4450_v9  ;;  %v4459_v38 = vpack.c.bf16 %v2090_v49, %v2089_v58 }
 0x5fb   :  { %v3462_v40 = vpop.f32.mrf.mxu1 }
 0x5fc   :  { %2363 = vst [vmem:[#allocation2 + $0x1c] sm:$0xf] %v3178_v54  ;;  %v4461_v43 = vmax.f32 %v2041_v34, 0.0  ;;  %v3463_v45 = vadd.f32 %v3462_v40, %v3461_v53 }
 0x5fd   :  { %v3464_v48 = vpop.f32.mrf.mxu1 }
 0x5fe   :  { %v3179_v50 = vpack.c.bf16 %v4461_v43, %v4461_v43  ;;  %v2044_v51 = vadd.f32 %v3463_v45, %v4450_v9 }
 0x5ff   :  { %v3465_v56 = vpop.f32.mrf.mxu1 }
 0x600   :  { %2364 = vst [vmem:[#allocation2 + $0x24] sm:$0xf] %v3179_v50  ;;  %v4466_v59 = vmax.f32 %v2044_v51, 0.0  ;;  %v3466_v20 = vadd.f32 %v3465_v56, %v3464_v48 }
 0x601   :  { %v3467_v60 = vpop.f32.mrf.mxu1 }
 0x602   :  { %v3180_v63 = vpack.c.bf16 %v4466_v59, %v4466_v59  ;;  %v2049_v62 = vadd.f32 %v3466_v20, %v4450_v9 }
 0x603   :  { %v3468_v44 = vpop.f32.mrf.mxu1 }
 0x604   :  { %2365 = vst [vmem:[#allocation2 + $0x2c] sm:$0xf] %v3180_v63  ;;  %v4471_v33 = vmax.f32 %v2049_v62, 0.0  ;;  %v3469_v24 = vadd.f32 %v3468_v44, %v3467_v60 }
 0x605   :  { %v3470_v10 = vpop.f32.mrf.mxu1 }
 0x606   :  { %v3181_v19 = vpack.c.bf16 %v4471_v33, %v4471_v33  ;;  %v2052_v21 = vadd.f32 %v3469_v24, %v4450_v9 }
 0x607   :  { %v3471_v22 = vpop.f32.mrf.mxu1 }
 0x608   :  { %2366 = vst [vmem:[#allocation2 + $0x34] sm:$0xf] %v3181_v19  ;;  %v4476_v23 = vmax.f32 %v2052_v21, 0.0  ;;  %v3472_v27 = vadd.f32 %v3471_v22, %v3470_v10 }
 0x609   :  { %v3473_v30 = vpop.f32.mrf.mxu1 }
 0x60a   :  { %v3182_v31 = vpack.c.bf16 %v4476_v23, %v4476_v23  ;;  %v2057_v0 = vadd.f32 %v3472_v27, %v4450_v9 }
 0x60b   :  { %v3474_v16 = vpop.f32.mrf.mxu1 }
 0x60c   :  { %2367 = vst [vmem:[#allocation2 + $0x3c] sm:$0xf] %v3182_v31  ;;  %v2095_v46 = vmax.f32 %v2057_v0, 0.0  ;;  %v3475_v35 = vadd.f32 %v3474_v16, %v3473_v30 }
 0x60d   :  { %v3476_v58 = vpop.f32.mrf.mxu1 }
 0x60e   :  { %v3183_v36 = vpack.c.bf16 %v2095_v46, %v2095_v46  ;;  %v2060_v39 = vadd.f32 %v3475_v35, %v4450_v9 }
 0x60f   :  { %v3477_v8 = vpop.f32.mrf.mxu1 }
 0x610   :  { %2368 = vst [vmem:[#allocation2 + $0x44] sm:$0xf] %v3183_v36  ;;  %v2096_v26 = vmax.f32 %v2060_v39, 0.0  ;;  %v3478_v32 = vadd.f32 %v3477_v8, %v3476_v58 }
 0x611   :  { %v3479_v49 = vpop.f32.mrf.mxu1 }
 0x612   :  { %v3184_v52 = vpack.c.bf16 %v2096_v26, %v2096_v26  ;;  %v2065_v53 = vadd.f32 %v3478_v32, %v4450_v9 }
 0x613   :  { %v3480_v54 = vpop.f32.mrf.mxu1 }
 0x614   :  { %2369 = vst [vmem:[#allocation2 + $0x4c] sm:$0xf] %v3184_v52  ;;  %v2097_v34 = vmax.f32 %v2065_v53, 0.0  ;;  %v3481_v40 = vadd.f32 %v3480_v54, %v3479_v49 }
 0x615   :  { %v3482_v45 = vpop.f32.mrf.mxu1 }
 0x616   :  { %v3185_v48 = vpack.c.bf16 %v2097_v34, %v2097_v34  ;;  %v2068_v50 = vadd.f32 %v3481_v40, %v4450_v9 }
 0x617   :  { %v3483_v51 = vpop.f32.mrf.mxu1 }
 0x618   :  { %2370 = vst [vmem:[#allocation2 + $0x54] sm:$0xf] %v3185_v48  ;;  %v2098_v56 = vmax.f32 %v2068_v50, 0.0  ;;  %v3484_v20 = vadd.f32 %v3483_v51, %v3482_v45  ;;  %v2107_v45 = vpack.c.bf16 %v2096_v26, %v2095_v46  ;;  %v2106_v48 = vpack.c.bf16 %v4476_v23, %v4471_v33  ;;  %v3849_v46 = vld [vmem:[#allocation11 + $0x78] sm:$0xff]   ;;  %v3851_v33 = vld [vmem:[#allocation11 + $0x70] sm:$0xff]   ;;  %v3854_v23 = vld [vmem:[#allocation11 + $0x28] sm:$0xff]  }
 0x619   :  { %v3485_v60 = vpop.f32.mrf.mxu1  ;;  %v3850_v26 = vld [vmem:[#allocation11 + $0x38] sm:$0xff]   ;;  %v3860_v50 = vld [vmem:[#allocation11 + $0x10] sm:$0xff]  }
 0x61a   :  { %v3186_v63 = vpack.c.bf16 %v2098_v56, %v2098_v56  ;;  %v2073_v62 = vadd.f32 %v3484_v20, %v4450_v9  ;;  %v2108_v40 = vpack.c.bf16 %v2098_v56, %v2097_v34  ;;  %v3859_v34 = vld [vmem:[#allocation11 + $0x50] sm:$0xff]  }
 0x61b   :  { %v3486_v44 = vpop.f32.mrf.mxu1 }
 0x61c   :  { %2371 = vst [vmem:[#allocation2 + $0x5c] sm:$0xf] %v3186_v63  ;;  %v2099_v24 = vmax.f32 %v2073_v62, 0.0  ;;  %v3487_v10 = vadd.f32 %v3486_v44, %v3485_v60 }
 0x61d   :  { %v3488_v19 = vpop.f32.mrf.mxu1 }
 0x61e   :  { %v3187_v21 = vpack.c.bf16 %v2099_v24, %v2099_v24  ;;  %v2076_v22 = vadd.f32 %v3487_v10, %v4450_v9 }
 0x61f   :  { %v3489_v27 = vpop.f32.mrf.mxu1 }
 0x620   :  { %2372 = vst [vmem:[#allocation2 + $0x64] sm:$0xf] %v3187_v21  ;;  %v2100_v30 = vmax.f32 %v2076_v22, 0.0  ;;  %v3490_v31 = vadd.f32 %v3489_v27, %v3488_v19 }
 0x621   :  { %v3491_v0 = vpop.f32.mrf.mxu1 }
 0x622   :  { %v3188_v16 = vpack.c.bf16 %v2100_v30, %v2100_v30  ;;  %v2081_v35 = vadd.f32 %v3490_v31, %v4450_v9  ;;  %v2109_v54 = vpack.c.bf16 %v2100_v30, %v2099_v24 }
 0x623   :  { %v3492_v58 = vpop.f32.mrf.mxu1 }
 0x624   :  { %2373 = vst [vmem:[#allocation2 + $0x6c] sm:$0xf] %v3188_v16  ;;  %v2101_v36 = vmax.f32 %v2081_v35, 0.0  ;;  %v3493_v39 = vadd.f32 %v3492_v58, %v3491_v0 }
 0x626   :  { %v3189_v8 = vpack.c.bf16 %v2101_v36, %v2101_v36  ;;  %v2084_v32 = vadd.f32 %v3493_v39, %v4450_v9  ;;  %v2105_v9 = vpack.c.bf16 %v4466_v59, %v4461_v43  ;;  %v3852_v43 = vld [vmem:[#allocation11 + $0x30] sm:$0xff]   ;;  %v3853_v59 = vld [vmem:[#allocation11 + $0x68] sm:$0xff]  }
 0x628   :  { %2374 = vst [vmem:[#allocation2 + $0x74] sm:$0xf] %v3189_v8  ;;  %v2102_v49 = vmax.f32 %v2084_v32, 0.0  ;;  %v3867_v32 = vld [vmem:[#allocation2 + $0x4] ss:$8 sps:$4 sm:$0xff]  }
 0x62a   :  { %v3190_v52 = vpack.c.bf16 %v2102_v49, %v2102_v49  ;;  %v2110_v53 = vpack.c.bf16 %v2102_v49, %v2101_v36 }
 0x62c   :  { %2375 = vst [vmem:[#allocation2 + $0x7c] sm:$0xf] %v3190_v52  ;;  %3670 = vmatprep.subr.bf16.mxu0 %v2110_v53 }
 0x62d   :  { %3671 = vmatpush3.bf16.msra.mxu0 %v2110_v53 }
 0x62e   :  { %3672 = vmatprep.subr.bf16.mxu0 %v2109_v54 }
 0x631   :  { %3673 = vmatpush3.bf16.msra.mxu0 %v2109_v54 }
 0x632   :  { %3674 = vmatprep.subr.bf16.mxu0 %v2108_v40 }
 0x635   :  { %3675 = vmatpush3.bf16.msra.mxu0 %v2108_v40 }
 0x636   :  { %3676 = vmatprep.subr.bf16.mxu0 %v2107_v45 }
 0x639   :  { %3677 = vmatpush3.bf16.msra.mxu0 %v2107_v45 }
 0x63a   :  { %3678 = vmatprep.subr.bf16.mxu0 %v2106_v48 }
 0x63d   :  { %3679 = vmatpush3.bf16.msra.mxu0 %v2106_v48 }
 0x63e   :  { %3680 = vmatprep.subr.bf16.mxu0 %v2105_v9 }
 0x641   :  { %3681 = vmatpush3.bf16.msra.mxu0 %v2105_v9 }
 0x642   :  { %3682 = vmatprep.subr.bf16.mxu0 %v4459_v38 }
 0x645   :  { %3683 = vmatpush3.bf16.msra.mxu0 %v4459_v38  ;;  %v3858_v38 = vld [vmem:[#allocation11 + $0x18] sm:$0xff]  }
 0x646   :  { %3684 = vmatprep.subr.bf16.mxu0 %v4455_v28 }
 0x649   :  { %3685 = vmatpush3.bf16.msra.mxu0 %v4455_v28  ;;  %v3857_v28 = vld [vmem:[#allocation11 + $0x58] sm:$0xff]  }
 0x64a   :  { %3510 = vmatprep.subr.bf16.mxu0 %v3849_v46 }
 0x64c   :  { %3687 = vmatmul.mubr.bf16.vlgmr.msra.gmra.mxu0 %v4410_v55  ;;  %v3855_v55 = vld [vmem:[#allocation11 + $0x60] sm:$0xff]  }
 0x64d   :  { %3690 = vmatprep.mubr.bf16.mxu0 %v4413_v47  ;;  %3511 = vmatpush3.bf16.msra.mxu0 %v3850_v26  ;;  %v3856_v47 = vld [vmem:[#allocation11 + $0x20] sm:$0xff]  }
 0x64e   :  { %3512 = vmatprep.subr.bf16.mxu0 %v3851_v33 }
 0x651   :  { %3513 = vmatpush3.bf16.msra.mxu0 %v3852_v43 }
 0x652   :  { %3514 = vmatprep.subr.bf16.mxu0 %v3853_v59 }
 0x654   :  { %3691 = vmatmul.mubr.bf16.gmra.mxu0 %v4416_v11  ;;  %v3861_v11 = vld [vmem:[#allocation11 + $0x48] sm:$0xff]  }
 0x655   :  { %3694 = vmatprep.mubr.bf16.mxu0 %v4419_v41  ;;  %3515 = vmatpush3.bf16.msra.mxu0 %v3854_v23  ;;  %v3862_v41 = vld [vmem:[#allocation11 + $0x8] sm:$0xff]  }
 0x656   :  { %3516 = vmatprep.subr.bf16.mxu0 %v3855_v55 }
 0x659   :  { %3517 = vmatpush3.bf16.msra.mxu0 %v3856_v47 }
 0x65a   :  { %3518 = vmatprep.subr.bf16.mxu0 %v3857_v28 }
 0x65c   :  { %3695 = vmatmul.mubr.bf16.gmra.mxu0 %v4422_v14  ;;  %v3863_v14 = vld [vmem:[#allocation11 + $0x40] sm:$0xff]  }
 0x65d   :  { %3698 = vmatprep.mubr.bf16.mxu0 %v4425_v15  ;;  %3519 = vmatpush3.bf16.msra.mxu0 %v3858_v38  ;;  %v3864_v15 = vld [vmem:[#allocation11] sm:$0xff]   ;;  %v3874_v38 = vld [vmem:[#allocation2 + $0x34] ss:$8 sps:$4 sm:$0xff]  }
 0x65e   :  { %3520 = vmatprep.subr.bf16.mxu0 %v3859_v34  ;;  %v3877_v34 = vld [vmem:[#allocation2 + $0x44] ss:$8 sps:$4 sm:$0xff]  }
 0x661   :  { %3521 = vmatpush3.bf16.msra.mxu0 %v3860_v50 }
 0x662   :  { %3522 = vmatprep.subr.bf16.mxu0 %v3861_v11 }
 0x664   :  { %3699 = vmatmul.mubr.bf16.gmra.mxu0 %v4428_v18 }
 0x665   :  { %3523 = vmatpush3.bf16.msra.mxu0 %v3862_v41  ;;  %2639 = vmatprep.mubr.bf16.mxu0 %v3867_v32  ;;  %v3883_v41 = vld [vmem:[#allocation2 + $0x64] ss:$8 sps:$4 sm:$0xff]  }
 0x666   :  { %3524 = vmatprep.subr.bf16.mxu0 %v3863_v14  ;;  %v3886_v14 = vld [vmem:[#allocation2 + $0x74] ss:$8 sps:$4 sm:$0xff]  }
 0x669   :  { %3525 = vmatpush3.bf16.msra.mxu0 %v3864_v15 }
 0x70c   :  { %v3688_v18 = vpop.f32.mrf.mxu0 }
 0x70d   :  { %v2210_v51 = vmul.f32 %v3688_v18, %v4247_v2 }
 0x70e   :  { %v2145_v56 = vpop.f32.mrf.mxu0 }
 0x70f   :  { %v3161_v20 = vpack.c.bf16 %v2210_v51, %v2210_v51  ;;  %v2208_v60 = vmul.f32 %v2145_v56, %v4245_v1 }
 0x710   :  { %v3689_v63 = vpop.f32.mrf.mxu0 }
 0x711   :  { %2290 = vst [vmem:[#allocation2 + $0x10] sm:$0xf] %v3161_v20  ;;  %v3159_v62 = vpack.c.bf16 %v2208_v60, %v2208_v60  ;;  %v2211_v44 = vmul.f32 %v3689_v63, %v4251_v4  ;;  %v4522_v60 = vld [vmem:[%s4556_s10] ss:$0 sm:$0xff]  ;;  %s4033_s10 = smov [#allocation12]  }
 0x712   :  { %v2148_v24 = vpop.f32.mrf.mxu0  ;;  %s2789_s5 = sshll.u32 %s4033_s10, 4  ;;  %s2790_s5 = int_to_ptr.vmem [resolvable:$true] %s2789_s5 }
 0x713   :  { %2288 = vst [vmem:[#allocation2] sm:$0xf] %v3159_v62  ;;  %v3162_v10 = vpack.c.bf16 %v2211_v44, %v2211_v44  ;;  %v2209_v19 = vmul.f32 %v2148_v24, %v4249_v3  ;;  %s3997_s9 = scalar_lea.vmem %s2790_s5, 1024  ;;  %p4002_p12 = scmp.lt.s32.totalorder %s2790_s5, %s2790_s5 }
 0x714   :  { %v3692_v21 = vpop.f32.mrf.mxu0  ;;  %p3998_p11 = scmp.ne.s32.totalorder %s2790_s5, %s3997_s9  ;;  %p4003_p13 = scmp.lt.s32.totalorder %s3997_s9, %s3997_s9 }
 0x715   :  { %2291 = vst [vmem:[#allocation2 + $0x18] sm:$0xf] %v3162_v10  ;;  %v3160_v22 = vpack.c.bf16 %v2209_v19, %v2209_v19  ;;  %v2214_v27 = vmul.f32 %v3692_v21, %v4257_v7 }
 0x716   :  { %v2161_v2 = vpop.f32.mrf.mxu0  ;;  %p4004_p0 = por %p4003_p13, %p4002_p12 }
 0x717   :  { %2289 = vst [vmem:[#allocation2 + $0x8] sm:$0xf] %v3160_v22  ;;  %v3165_v30 = vpack.c.bf16 %v2214_v27, %v2214_v27  ;;  %v2212_v1 = vmul.f32 %v2161_v2, %v4253_v5 }
 0x718   :  { %v3693_v31 = vpop.f32.mrf.mxu0  ;;  %p4005_p1 = pnand %p4004_p0, %p3998_p11 }
 0x719   :  { %2294 = vst [vmem:[#allocation2 + $0x30] sm:$0xf] %v3165_v30  ;;  %v3163_v0 = vpack.c.bf16 %v2212_v1, %v2212_v1  ;;  %v2215_v4 = vmul.f32 %v3693_v31, %v4261_v13  ;;  %v3868_v13 = vld [vmem:[#allocation2 + $0x14] ss:$8 sps:$4 sm:$0xff]  }
 0x71a   :  { %v2164_v16 = vpop.f32.mrf.mxu0 }
 0x71b   :  { %2292 = vst [vmem:[#allocation2 + $0x20] sm:$0xf] %v3163_v0  ;;  %v3166_v35 = vpack.c.bf16 %v2215_v4, %v2215_v4  ;;  %v2213_v3 = vmul.f32 %v2164_v16, %v4255_v6 }
 0x71c   :  { %v3696_v58 = vpop.f32.mrf.mxu0  ;;  %v3870_v33 = vld [vmem:[#allocation2 + $0x10] ss:$8 sps:$4 sm:$0xff]  }
 0x71d   :  { %2295 = vst [vmem:[#allocation2 + $0x38] sm:$0xf] %v3166_v35  ;;  %v3164_v36 = vpack.c.bf16 %v2213_v3, %v2213_v3  ;;  %v2218_v7 = vmul.f32 %v3696_v58, %v4271_v29 }
 0x71e   :  { %v2177_v39 = vpop.f32.mrf.mxu0  ;;  %v3865_v8 = vld [vmem:[#allocation2] ss:$8 sps:$4 sm:$0xff]  }
 0x71f   :  { %2293 = vst [vmem:[#allocation2 + $0x28] sm:$0xf] %v3164_v36  ;;  %v3169_v5 = vpack.c.bf16 %v2218_v7, %v2218_v7  ;;  %v2216_v49 = vmul.f32 %v2177_v39, %v4264_v17  ;;  %2640 = vmatmul.mubr.bf16.vlgmr.msra.gmra.mxu0 %v3865_v8 }
 0x720   :  { %v3697_v52 = vpop.f32.mrf.mxu0  ;;  %2647 = vmatprep.mubr.bf16.mxu0 %v3868_v13 }
 0x721   :  { %2298 = vst [vmem:[#allocation2 + $0x50] sm:$0xf] %v3169_v5  ;;  %v3167_v53 = vpack.c.bf16 %v2216_v49, %v2216_v49  ;;  %v2219_v54 = vmul.f32 %v3697_v52, %v4275_v37  ;;  %v3871_v37 = vld [vmem:[#allocation2 + $0x24] ss:$8 sps:$4 sm:$0xff]  }
 0x722   :  { %v2180_v6 = vpop.f32.mrf.mxu0 }
 0x723   :  { %2296 = vst [vmem:[#allocation2 + $0x40] sm:$0xf] %v3167_v53  ;;  %v3170_v40 = vpack.c.bf16 %v2219_v54, %v2219_v54  ;;  %v2217_v29 = vmul.f32 %v2180_v6, %v4268_v25 }
 0x724   :  { %v3700_v45 = vpop.f32.mrf.mxu0 }
 0x725   :  { %2299 = vst [vmem:[#allocation2 + $0x58] sm:$0xf] %v3170_v40  ;;  %v3168_v48 = vpack.c.bf16 %v2217_v29, %v2217_v29  ;;  %v2222_v9 = vmul.f32 %v3700_v45, %v4285_v61 }
 0x726   :  { %v2193_v17 = vpop.f32.mrf.mxu0  ;;  %v3873_v28 = vld [vmem:[#allocation2 + $0x20] ss:$8 sps:$4 sm:$0xff]  }
 0x727   :  { %2297 = vst [vmem:[#allocation2 + $0x48] sm:$0xf] %v3168_v48  ;;  %v3173_v46 = vpack.c.bf16 %v2222_v9, %v2222_v9  ;;  %v2220_v26 = vmul.f32 %v2193_v17, %v4278_v42  ;;  %2648 = vmatmul.mubr.bf16.gmra.mxu0 %v3870_v33  ;;  %v3876_v42 = vld [vmem:[#allocation2 + $0x30] ss:$8 sps:$4 sm:$0xff]  }
 0x728   :  { %v3701_v43 = vpop.f32.mrf.mxu0  ;;  %2655 = vmatprep.mubr.bf16.mxu0 %v3871_v37 }
 0x729   :  { %2302 = vst [vmem:[#allocation2 + $0x70] sm:$0xf] %v3173_v46  ;;  %v3171_v59 = vpack.c.bf16 %v2220_v26, %v2220_v26  ;;  %v2223_v23 = vmul.f32 %v3701_v43, %v4289_v12  ;;  %v3880_v12 = vld [vmem:[#allocation2 + $0x54] ss:$8 sps:$4 sm:$0xff]  }
 0x72a   :  { %v2196_v55 = vpop.f32.mrf.mxu0 }
 0x72b   :  { %2300 = vst [vmem:[#allocation2 + $0x60] sm:$0xf] %v3171_v59  ;;  %v3174_v25 = vpack.c.bf16 %v2223_v23, %v2223_v23  ;;  %v2221_v47 = vmul.f32 %v2196_v55, %v4282_v57 }
 0x72c   :  { %v3882_v11 = vld [vmem:[#allocation2 + $0x50] ss:$8 sps:$4 sm:$0xff]  }
 0x72d   :  { %2303 = vst [vmem:[#allocation2 + $0x78] sm:$0xf] %v3174_v25  ;;  %v3172_v61 = vpack.c.bf16 %v2221_v47, %v2221_v47 }
 0x72e   :  { %v3879_v50 = vld [vmem:[#allocation2 + $0x40] ss:$8 sps:$4 sm:$0xff]  }
 0x72f   :  { %2301 = vst [vmem:[#allocation2 + $0x68] sm:$0xf] %v3172_v61  ;;  %2656 = vmatmul.mubr.bf16.gmra.mxu0 %v3873_v28 }
 0x730   :  { %2663 = vmatprep.mubr.bf16.mxu0 %v3874_v38 }
 0x734   :  { %v3888_v15 = vld [vmem:[#allocation2 + $0x70] ss:$8 sps:$4 sm:$0xff]  }
 0x736   :  { %v3885_v57 = vld [vmem:[#allocation2 + $0x60] ss:$8 sps:$4 sm:$0xff]  }
 0x737   :  { %2664 = vmatmul.mubr.bf16.gmra.mxu0 %v3876_v42 }
 0x738   :  { %2671 = vmatprep.mubr.bf16.mxu0 %v3877_v34 }
 0x73f   :  { %2672 = vmatmul.mubr.bf16.gmra.mxu0 %v3879_v50 }
 0x740   :  { %2679 = vmatprep.mubr.bf16.mxu0 %v3880_v12 }
 0x747   :  { %2680 = vmatmul.mubr.bf16.gmra.mxu0 %v3882_v11 }
 0x748   :  { %2687 = vmatprep.mubr.bf16.mxu0 %v3883_v41 }
 0x74f   :  { %2688 = vmatmul.mubr.bf16.gmra.mxu0 %v3885_v57 }
 0x750   :  { %2695 = vmatprep.mubr.bf16.mxu0 %v3886_v14 }
 0x757   :  { %2696 = vmatmul.mubr.bf16.gmra.mxu0 %v3888_v15 }
 0x7df   :  { %v3526_v18 = vpop.f32.mrf.mxu0 }
 0x7e1   :  { %v3527_v51 = vpop.f32.mrf.mxu0 }
 0x7e2   :  { %v3528_v20 = vadd.f32 %v3527_v51, %v3526_v18 }
 0x7e3   :  { %v3529_v56 = vpop.f32.mrf.mxu0 }
 0x7e4   :  { %v2642_v24 = vadd.f32 %v3528_v20, %v4522_v60 }
 0x7e5   :  { %v3530_v63 = vpop.f32.mrf.mxu0 }
 0x7e6   :  { %v3531_v62 = vadd.f32 %v3530_v63, %v3529_v56 }
 0x7e7   :  { %v3532_v44 = vpop.f32.mrf.mxu0 }
 0x7e8   :  { %v2645_v10 = vadd.f32 %v3531_v62, %v4522_v60 }
 0x7e9   :  { %v3533_v19 = vpop.f32.mrf.mxu0 }
 0x7ea   :  { %v3210_v21 = vpack.c.bf16 %v2645_v10, %v2642_v24  ;;  %v3534_v27 = vadd.f32 %v3533_v19, %v3532_v44 }
 0x7eb   :  { %v3535_v22 = vpop.f32.mrf.mxu0 }
 0x7ec   :  { %3211 = vst [vmem:[#allocation12] sm:$0xff] %v3210_v21   ;;  %v2650_v31 = vadd.f32 %v3534_v27, %v4522_v60 }
 0x7ed   :  { %v3536_v2 = vpop.f32.mrf.mxu0 }
 0x7ee   :  { %v3537_v30 = vadd.f32 %v3536_v2, %v3535_v22 }
 0x7ef   :  { %v3538_v1 = vpop.f32.mrf.mxu0 }
 0x7f0   :  { %v2653_v0 = vadd.f32 %v3537_v30, %v4522_v60 }
 0x7f1   :  { %v3539_v4 = vpop.f32.mrf.mxu0 }
 0x7f2   :  { %v3215_v16 = vpack.c.bf16 %v2653_v0, %v2650_v31  ;;  %v3540_v3 = vadd.f32 %v3539_v4, %v3538_v1 }
 0x7f3   :  { %v3541_v35 = vpop.f32.mrf.mxu0 }
 0x7f4   :  { %3247 = vst [vmem:[#allocation12 + $0x8] sm:$0xff] %v3215_v16   ;;  %v2658_v39 = vadd.f32 %v3540_v3, %v4522_v60 }
 0x7f5   :  { %v3542_v58 = vpop.f32.mrf.mxu0 }
 0x7f6   :  { %v3543_v36 = vadd.f32 %v3542_v58, %v3541_v35 }
 0x7f7   :  { %v3544_v7 = vpop.f32.mrf.mxu0 }
 0x7f8   :  { %v2661_v8 = vadd.f32 %v3543_v36, %v4522_v60 }
 0x7f9   :  { %v3545_v32 = vpop.f32.mrf.mxu0 }
 0x7fa   :  { %v3220_v5 = vpack.c.bf16 %v2661_v8, %v2658_v39  ;;  %v3546_v52 = vadd.f32 %v3545_v32, %v3544_v7 }
 0x7fb   :  { %v3547_v49 = vpop.f32.mrf.mxu0 }
 0x7fc   :  { %3248 = vst [vmem:[#allocation12 + $0x10] sm:$0xff] %v3220_v5   ;;  %v2666_v6 = vadd.f32 %v3546_v52, %v4522_v60 }
 0x7fd   :  { %v3548_v13 = vpop.f32.mrf.mxu0 }
 0x7fe   :  { %v3549_v53 = vadd.f32 %v3548_v13, %v3547_v49 }
 0x7ff   :  { %v3550_v54 = vpop.f32.mrf.mxu0 }
 0x800   :  { %v2669_v40 = vadd.f32 %v3549_v53, %v4522_v60 }
 0x801   :  { %v3551_v29 = vpop.f32.mrf.mxu0 }
 0x802   :  { %v3225_v45 = vpack.c.bf16 %v2669_v40, %v2666_v6  ;;  %v3552_v9 = vadd.f32 %v3551_v29, %v3550_v54 }
 0x803   :  { %v3553_v48 = vpop.f32.mrf.mxu0 }
 0x804   :  { %3249 = vst [vmem:[#allocation12 + $0x18] sm:$0xff] %v3225_v45   ;;  %v2674_v33 = vadd.f32 %v3552_v9, %v4522_v60 }
 0x805   :  { %v3554_v17 = vpop.f32.mrf.mxu0 }
 0x806   :  { %v3555_v46 = vadd.f32 %v3554_v17, %v3553_v48 }
 0x807   :  { %v3556_v26 = vpop.f32.mrf.mxu0 }
 0x808   :  { %v2677_v43 = vadd.f32 %v3555_v46, %v4522_v60 }
 0x809   :  { %v3557_v37 = vpop.f32.mrf.mxu0 }
 0x80a   :  { %v3230_v59 = vpack.c.bf16 %v2677_v43, %v2674_v33  ;;  %v3558_v55 = vadd.f32 %v3557_v37, %v3556_v26 }
 0x80b   :  { %v3559_v23 = vpop.f32.mrf.mxu0 }
 0x80c   :  { %3250 = vst [vmem:[#allocation12 + $0x20] sm:$0xff] %v3230_v59   ;;  %v2682_v28 = vadd.f32 %v3558_v55, %v4522_v60 }
 0x80d   :  { %v3560_v25 = vpop.f32.mrf.mxu0 }
 0x80e   :  { %v3561_v47 = vadd.f32 %v3560_v25, %v3559_v23 }
 0x80f   :  { %v3562_v61 = vpop.f32.mrf.mxu0 }
 0x810   :  { %v2685_v38 = vadd.f32 %v3561_v47, %v4522_v60 }
 0x811   :  { %v3563_v42 = vpop.f32.mrf.mxu0 }
 0x812   :  { %v3235_v34 = vpack.c.bf16 %v2685_v38, %v2682_v28  ;;  %v3564_v12 = vadd.f32 %v3563_v42, %v3562_v61 }
 0x813   :  { %v3565_v50 = vpop.f32.mrf.mxu0 }
 0x814   :  { %3251 = vst [vmem:[#allocation12 + $0x28] sm:$0xff] %v3235_v34   ;;  %v2690_v14 = vadd.f32 %v3564_v12, %v4522_v60 }
 0x815   :  { %v3566_v11 = vpop.f32.mrf.mxu0 }
 0x816   :  { %v3567_v41 = vadd.f32 %v3566_v11, %v3565_v50 }
 0x817   :  { %v3568_v57 = vpop.f32.mrf.mxu0 }
 0x818   :  { %v2693_v15 = vadd.f32 %v3567_v41, %v4522_v60 }
 0x819   :  { %v3569_v18 = vpop.f32.mrf.mxu0 }
 0x81a   :  { %v3240_v51 = vpack.c.bf16 %v2693_v15, %v2690_v14  ;;  %v3570_v20 = vadd.f32 %v3569_v18, %v3568_v57 }
 0x81b   :  { %v3571_v56 = vpop.f32.mrf.mxu0 }
 0x81c   :  { %3252 = vst [vmem:[#allocation12 + $0x30] sm:$0xff] %v3240_v51   ;;  %v2698_v44 = vadd.f32 %v3570_v20, %v4522_v60 }
 0x81d   :  { %v3572_v63 = vpop.f32.mrf.mxu0 }
 0x81e   :  { %v3573_v62 = vadd.f32 %v3572_v63, %v3571_v56 }
 0x820   :  { %v2701_v24 = vadd.f32 %v3573_v62, %v4522_v60 }
 0x822   :  { %v3245_v10 = vpack.c.bf16 %v2701_v24, %v2698_v44 }
 0x824   :  { %3253 = vst [vmem:[#allocation12 + $0x38] sm:$0xff] %v3245_v10  }
 0x825   :  { %4008 = shalt.err (!%p4005_p1)
}
 0x826   :  { %2795 = dma.vmem_to_hbm [thread:$0]  %s2790_s5, 1024, %s4557_s11, [#allocation5], %s4027_s22, %s4027_s22, %s4028_s23  }
 0x827   :  { %4023 = dma.done.wait [#allocation5], 1024  }
 0x828   :  { %4024 = vsyncadd [#allocation5], 4294966272 }
 0x829   :  { %2799 = vsyncpa [#allocation4], 1 }
 0x82a   :  { %2800 = vsyncpa [#allocation7], 1 }
 0x82b   :  { %2801 = vsyncpa [#allocation10], 1 }
 0x82c   :  { %2802 = vsyncpa [#allocation5], 1 }

</bundles_post_ra>
